<compile_context>
chip_gen: v7x
topology: tpu7x:2x2x1
jax: 0.10.0
libtpu: 0.0.40
codegen_flags: <defaults>
</compile_context>

<pallas_src>
import functools

import jax
import jax.numpy as jnp
from jax.experimental import pallas as pl
from jax.experimental.pallas import tpu as pltpu


# ----------------------------- small math helpers (usable in & out of kernel)

def _layer_norm(x, g, b, eps=1e-5):
    mu = jnp.mean(x, axis=-1, keepdims=True)
    var = jnp.mean(jnp.square(x - mu), axis=-1, keepdims=True)
    return (x - mu) * jax.lax.rsqrt(var + eps) * g + b


def _quick_gelu(x):
    # CLIP uses QuickGELU: x * sigmoid(1.702 x)
    return x * jax.nn.sigmoid(1.702 * x)


# ----------------------------------------------------------------- the kernel

def text_encoder_kernel(
    eot_ref,                                   # (BN_pad,) int32, scalar-prefetch (SMEM)
    x_ref, pos_ref, srow_ref, scol_ref,
    ln1g_ref, ln1b_ref,
    wq_ref, bq_ref, wk_ref, bk_ref, wv_ref, bv_ref, wo_ref, bo_ref,
    ln2g_ref, ln2b_ref, wfc_ref, bfc_ref, wpr_ref, bpr_ref,
    lnfg_ref, lnfb_ref, tproj_ref,
    o_ref,
    x_scratch,
    *, n_heads, seq_len, width, seqs_per_step,
):
    S, L, D, H = seqs_per_step, seq_len, width, n_heads
    SL = S * L
    hd = D // H
    f32 = jnp.float32
    bf16 = jnp.bfloat16

    i = pl.program_id(0)            # group of S sequences
    l = pl.program_id(1)            # transformer layer (streamed)
    n_layers = pl.num_programs(1)

    # ---- first layer step: load prompts and add positional embedding
    @pl.when(l == 0)
    def _():
        x_scratch[...] = x_ref[0].astype(f32) + pos_ref[...].astype(f32)

    x = x_scratch[...]                                        # (SL, D) f32

    # -------------------------------------------- multi-head self-attention
    h = _layer_norm(x, ln1g_ref[0], ln1b_ref[0]).astype(bf16)     # (SL, D)

    # Full-width projections in "transposed" orientation:
    #   qT[d_out, n] = sum_d Wq^T[d_out, d] * h[n, d]     -> (D, SL), K = D wide.
    # The 1/sqrt(hd) scale is already folded into wq/bq by the wrapper.
    nt = (((1,), (1,)), ((), ()))
    qT = jax.lax.dot_general(wq_ref[0], h, nt, preferred_element_type=f32) + bq_ref[0]
    kT = jax.lax.dot_general(wk_ref[0], h, nt, preferred_element_type=f32) + bk_ref[0]
    vT = jax.lax.dot_general(wv_ref[0], h, nt, preferred_element_type=f32) + bv_ref[0]

    # Split the sublane dim D -> (H, hd): free reshape.  Only q needs the
    # minor-dim transpose to (H, SL, hd) so both batched dots below are in the
    # canonical ("nn" / "nt") batched-matmul forms.
    qm = jnp.swapaxes(qT.reshape(H, hd, SL), 1, 2).astype(bf16)   # (H, SL, hd)
    kh = kT.reshape(H, hd, SL).astype(bf16)                       # (H, hd, SL)
    vh = vT.reshape(H, hd, SL).astype(bf16)                       # (H, hd, SL)

    # scores: batch over heads, per-head (SL, hd) @ (hd, SL)
    s = jax.lax.dot_general(qm, kh, (((2,), (1,)), ((0,), (0,))),
                            preferred_element_type=f32)           # (H, SL, SL)

    # block-diagonal causal mask, built in-kernel (no (SL,SL) f32 input)
    ri = jax.lax.broadcasted_iota(jnp.int32, (SL, SL), 0)
    ci = jax.lax.broadcasted_iota(jnp.int32, (SL, SL), 1)
    same_seq = (jnp.broadcast_to(srow_ref[...], (SL, SL)) ==
                jnp.broadcast_to(scol_ref[...], (SL, SL)))
    mask2d = jnp.where(same_seq & (ci <= ri), 0.0, -1e9).astype(f32)
    s = s + mask2d[None, :, :]

    # softmax (f32 statistics, exact divide)
    s = s - jnp.max(s, axis=-1, keepdims=True)
    p = jnp.exp(s)
    p = p / jnp.sum(p, axis=-1, keepdims=True)

    # P @ V in the transposed domain: ctxT[h, d, q] = sum_j v[h, d, j] p[h, q, j]
    ctxT = jax.lax.dot_general(vh, p.astype(bf16), (((2,), (2,)), ((0,), (0,))),
                               preferred_element_type=f32)        # (H, hd, SL)

    # concat heads along the sublane dim (free reshape) and apply the
    # full-width output projection: attn[n, e] = sum_j ctx[n, j] Wo[j, e]
    ctx2 = ctxT.reshape(D, SL).astype(bf16)                       # (D, SL)
    attn = jax.lax.dot_general(ctx2, wo_ref[0], (((0,), (0,)), ((), ())),
                               preferred_element_type=f32)        # (SL, D)
    x = x + attn + bo_ref[0]

    # ------------------------------------------------------------------ MLP
    h2 = _layer_norm(x, ln2g_ref[0], ln2b_ref[0]).astype(bf16)
    f = jnp.dot(h2, wfc_ref[0], preferred_element_type=f32) + bfc_ref[0]
    f = _quick_gelu(f).astype(bf16)
    x = x + jnp.dot(f, wpr_ref[0], preferred_element_type=f32) + bpr_ref[0]

    x_scratch[...] = x

    # --------- last layer: gather EOT rows first, then LN + text projection
    @pl.when(l == n_layers - 1)
    def _():
        rows = []
        for s_i in range(S):
            idx = eot_ref[i * S + s_i]                             # scalar (SMEM)
            rows.append(x_scratch[pl.ds(s_i * L + idx, 1), :])     # (1, D)
        eot_x = rows[0] if S == 1 else jnp.concatenate(rows, axis=0)   # (S, D)
        eot_x = _layer_norm(eot_x, lnfg_ref[...], lnfb_ref[...])
        proj = jnp.dot(eot_x.astype(bf16), tproj_ref[...],
                       preferred_element_type=f32)                 # (S, P)
        o_ref[0] = proj.astype(o_ref.dtype)


# ------------------------------------------------------------------- wrapper

def text_encoder(prompts, tokenized_prompts, params, *, seqs_per_step=4,
                 vmem_limit_bytes=48 * 1024 * 1024):
    B, N, L, D = prompts.shape
    BN = B * N
    NL = params["wq"].shape[0]
    H = int(params["n_heads"])
    hd = D // H
    P = params["text_projection"].shape[-1]

    # pad BN up to a multiple of S (no silent S=1 fallback)
    S = max(1, int(seqs_per_step))
    G = -(-BN // S)
    BNp = G * S
    pad = BNp - BN
    SL = S * L

    f32 = jnp.float32
    bf16 = jnp.bfloat16
    scale = 1.0 / float(hd) ** 0.5

    # -- activations grouped S sequences per grid step (padded)
    x = prompts.astype(f32).reshape(BN, L, D)
    # EOT index per sequence (assumes the EOT token id is the unique argmax,
    # same assumption as the PyTorch reference), prefetched into SMEM.
    eot_idx = jnp.argmax(tokenized_prompts.reshape(BN, L), axis=-1).astype(jnp.int32)
    if pad:
        x = jnp.concatenate([x, jnp.zeros((pad, L, D), f32)], axis=0)
        eot_idx = jnp.concatenate([eot_idx, jnp.zeros((pad,), jnp.int32)], axis=0)
    x = x.reshape(G, SL, D)

    # -- positional embedding tiled over the S sequences of a group
    pos = jnp.tile(params["pos"].astype(f32), (S, 1))               # (SL, D)

    # -- tiny sequence-id vectors for the in-kernel block-diagonal mask
    seq_id = jnp.repeat(jnp.arange(S, dtype=jnp.int32), L)          # (SL,)
    seq_row = seq_id.reshape(SL, 1)
    seq_col = seq_id.reshape(1, SL)

    # -- weight layouts (plain JAX, once, outside the kernel)
    #    Q/K/V weights transposed (W^T) for the (D, SL) projection matmuls;
    #    1/sqrt(hd) scale folded into Wq / bq.
    wqT = (params["wq"] * scale).transpose(0, 2, 1).astype(bf16)    # (NL, D, D)
    bqT = (params["bq"] * scale).transpose(0, 2, 1).astype(f32)     # (NL, D, 1)
    wkT = params["wk"].transpose(0, 2, 1).astype(bf16)
    bkT = params["bk"].transpose(0, 2, 1).astype(f32)
    wvT = params["wv"].transpose(0, 2, 1).astype(bf16)
    bvT = params["bv"].transpose(0, 2, 1).astype(f32)
    wo = params["wo"].astype(bf16)                                  # (NL, D, D)
    bo = params["bo"].astype(f32)
    ln1g, ln1b = params["ln1_g"].astype(f32), params["ln1_b"].astype(f32)
    ln2g, ln2b = params["ln2_g"].astype(f32), params["ln2_b"].astype(f32)
    wfc, bfc = params["wfc"].astype(bf16), params["bfc"].astype(f32)
    wpr, bpr = params["wpr"].astype(bf16), params["bpr"].astype(f32)
    lnfg, lnfb = params["lnf_g"].astype(f32), params["lnf_b"].astype(f32)
    tproj = params["text_projection"].astype(bf16)

    per_layer = [ln1g, ln1b, wqT, bqT, wkT, bkT, wvT, bvT, wo, bo,
                 ln2g, ln2b, wfc, bfc, wpr, bpr]
    finals = [lnfg, lnfb, tproj]

    def layer_spec(arr):     # stream layer `l` of a (NL, ...) parameter
        zeros = (0,) * (arr.ndim - 1)
        return pl.BlockSpec((1,) + tuple(arr.shape[1:]),
                            lambda i, l, eot, z=zeros: (l,) + z)

    def const_spec(arr):     # layer-invariant parameter, single block
        zeros = (0,) * arr.ndim
        return pl.BlockSpec(tuple(arr.shape), lambda i, l, eot, z=zeros: z)

    in_specs = (
        [pl.BlockSpec((1, SL, D), lambda i, l, eot: (i, 0, 0)),     # prompts group
         const_spec(pos), const_spec(seq_row), const_spec(seq_col)]
        + [layer_spec(w) for w in per_layer]
        + [const_spec(w) for w in finals]
    )

    kernel = functools.partial(
        text_encoder_kernel,
        n_heads=H, seq_len=L, width=D, seqs_per_step=S,
    )

    out = pl.pallas_call(
        kernel,
        grid_spec=pltpu.PrefetchScalarGridSpec(
            num_scalar_prefetch=1,
            grid=(G, NL),                          # (sequence groups, layers)
            in_specs=in_specs,
            out_specs=pl.BlockSpec((1, S, P), lambda i, l, eot: (i, 0, 0)),
            scratch_shapes=[pltpu.VMEM((SL, D), f32)],   # residual stream
        ),
        out_shape=jax.ShapeDtypeStruct((G, S, P), f32),
        compiler_params=pltpu.CompilerParams(
            dimension_semantics=("parallel", "arbitrary"),
            vmem_limit_bytes=vmem_limit_bytes,
        ),
    )(eot_idx, x, pos, seq_row, seq_col, *per_layer, *finals)

    out = out.reshape(BNp, P)[:BN]                 # drop padded sequences
    return out.reshape(B, N, P)


# --------------------------------------------------- deterministic parameters

def init_params(key, num_layers, L, D, n_heads, P):
    ks = jax.random.split(key, 8)
    s = 0.02
    f32 = jnp.float32
    return {
        "n_heads": n_heads,
        "pos":   (jax.random.normal(ks[0], (L, D), f32) * 0.01),
        "ln1_g": jnp.ones((num_layers, 1, D), f32),
        "ln1_b": jnp.zeros((num_layers, 1, D), f32),
        "wq":    jax.random.normal(ks[1], (num_layers, D, D), f32) * s,
        "bq":    jnp.zeros((num_layers, 1, D), f32),
        "wk":    jax.random.normal(ks[2], (num_layers, D, D), f32) * s,
        "bk":    jnp.zeros((num_layers, 1, D), f32),
        "wv":    jax.random.normal(ks[3], (num_layers, D, D), f32) * s,
        "bv":    jnp.zeros((num_layers, 1, D), f32),
        "wo":    jax.random.normal(ks[4], (num_layers, D, D), f32) * s,
        "bo":    jnp.zeros((num_layers, 1, D), f32),
        "ln2_g": jnp.ones((num_layers, 1, D), f32),
        "ln2_b": jnp.zeros((num_layers, 1, D), f32),
        "wfc":   jax.random.normal(ks[5], (num_layers, D, 4 * D), f32) * s,
        "bfc":   jnp.zeros((num_layers, 1, 4 * D), f32),
        "wpr":   jax.random.normal(ks[6], (num_layers, 4 * D, D), f32) * s,
        "bpr":   jnp.zeros((num_layers, 1, D), f32),
        "lnf_g": jnp.ones((1, D), f32),
        "lnf_b": jnp.zeros((1, D), f32),
        "text_projection": jax.random.normal(ks[7], (D, P), f32) * s,
    }


# ------------------------------------------------ pure-JAX reference (checks)

def _reference_single(x, tok, params, n_heads):
    L, D = x.shape
    hd = D // n_heads
    num_layers = params["wq"].shape[0]
    x = x + params["pos"]
    mask = jnp.where(jnp.tril(jnp.ones((L, L), bool)), 0.0, -1e9)
    for l in range(num_layers):
        h = _layer_norm(x, params["ln1_g"][l], params["ln1_b"][l])
        q = h @ params["wq"][l] + params["bq"][l]
        k = h @ params["wk"][l] + params["bk"][l]
        v = h @ params["wv"][l] + params["bv"][l]
        outs = []
        for hh in range(n_heads):
            sl = slice(hh * hd, (hh + 1) * hd)
            s = (q[:, sl] @ k[:, sl].T) / jnp.sqrt(float(hd)) + mask
            p = jax.nn.softmax(s, axis=-1)
            outs.append(p @ v[:, sl])
        attn = jnp.concatenate(outs, axis=-1)
        x = x + attn @ params["wo"][l] + params["bo"][l]
        h2 = _layer_norm(x, params["ln2_g"][l], params["ln2_b"][l])
        f = _quick_gelu(h2 @ params["wfc"][l] + params["bfc"][l])
        x = x + f @ params["wpr"][l] + params["bpr"][l]
    x = _layer_norm(x, params["lnf_g"], params["lnf_b"])
    eot = x[jnp.argmax(tok)]
    return eot @ params["text_projection"]


def reference_forward(prompts, tokenized_prompts, params):
    B, N, L, D = prompts.shape
    x = prompts.reshape(-1, L, D)
    tok = tokenized_prompts.reshape(-1, L)
    n_heads = int(params["n_heads"])
    out = jax.vmap(lambda a, b: _reference_single(a, b, params, n_heads))(x, tok)
    return out.reshape(B, N, -1)


# -------------------------------------------------------------------- driver

if __name__ == "__main__":
    B, N, L, D, H, P, NL = 2, 2, 8, 32, 4, 32, 2

    key = jax.random.PRNGKey(0)
    k_par, k_x, k_tok = jax.random.split(key, 3)

    params = init_params(k_par, NL, L, D, H, P)
    prompts = jax.random.normal(k_x, (B, N, L, D), jnp.float32) * 0.1

    # token ids with a unique maximum (the EOT token, id 49407) per sequence
    base = jax.random.randint(k_tok, (B, N, L), 1, 100, dtype=jnp.int32)
    eot_pos = (jnp.arange(B * N, dtype=jnp.int32) % (L - 2) + 2).reshape(B, N)
    tokenized = jnp.where(
        jnp.arange(L, dtype=jnp.int32)[None, None, :] == eot_pos[..., None],
        jnp.int32(49407), base)

    out = text_encoder(prompts, tokenized, params, seqs_per_step=4)
    out = jax.block_until_ready(out)

    ref = reference_forward(prompts, tokenized, params)
    assert out.shape == (B, N, P), out.shape
    # bf16 weights / matmul operands in the kernel vs f32 reference -> looser tol
    assert jnp.allclose(out, ref, atol=3e-2, rtol=3e-2), (
        float(jnp.max(jnp.abs(out - ref))))

    print("KERNEL_OK")
</pallas_src>

<mosaic_0001>
module attributes {stable_mosaic.version = 11 : i64} {
  func.func @text_encoder_kernel(%arg0: i32, %arg1: i32, %arg2: memref<4xi32, #tpu.memory_space<smem>>, %arg3: memref<1x32x32xf32, #tpu.memory_space<vmem>>, %arg4: memref<32x32xf32, #tpu.memory_space<vmem>>, %arg5: memref<32x1xi32, #tpu.memory_space<vmem>>, %arg6: memref<1x32xi32, #tpu.memory_space<vmem>>, %arg7: memref<1x1x32xf32, #tpu.memory_space<vmem>>, %arg8: memref<1x1x32xf32, #tpu.memory_space<vmem>>, %arg9: memref<1x32x32xbf16, #tpu.memory_space<vmem>>, %arg10: memref<1x32x1xf32, #tpu.memory_space<vmem>>, %arg11: memref<1x32x32xbf16, #tpu.memory_space<vmem>>, %arg12: memref<1x32x1xf32, #tpu.memory_space<vmem>>, %arg13: memref<1x32x32xbf16, #tpu.memory_space<vmem>>, %arg14: memref<1x32x1xf32, #tpu.memory_space<vmem>>, %arg15: memref<1x32x32xbf16, #tpu.memory_space<vmem>>, %arg16: memref<1x1x32xf32, #tpu.memory_space<vmem>>, %arg17: memref<1x1x32xf32, #tpu.memory_space<vmem>>, %arg18: memref<1x1x32xf32, #tpu.memory_space<vmem>>, %arg19: memref<1x32x128xbf16, #tpu.memory_space<vmem>>, %arg20: memref<1x1x128xf32, #tpu.memory_space<vmem>>, %arg21: memref<1x128x32xbf16, #tpu.memory_space<vmem>>, %arg22: memref<1x1x32xf32, #tpu.memory_space<vmem>>, %arg23: memref<1x32xf32, #tpu.memory_space<vmem>>, %arg24: memref<1x32xf32, #tpu.memory_space<vmem>>, %arg25: memref<32x32xbf16, #tpu.memory_space<vmem>>, %arg26: memref<1x4x32xf32, #tpu.memory_space<vmem>>, %arg27: memref<32x32xf32, #tpu.memory_space<vmem>>) attributes {dimension_semantics = [#tpu.dimension_semantics<parallel>, #tpu.dimension_semantics<arbitrary>], iteration_bounds = array<i64: 1, 2>, scalar_prefetch = 1 : i64, scratch_operands = 1 : i64, tpu.core_type = #tpu.core_type<tc>, window_params = [{transform_indices = @transform_0, window_bounds = array<i64: 1, 32, 32>}, {pipeline_mode = #tpu.pipeline_mode<synchronous>, transform_indices = @transform_1, window_bounds = array<i64: 32, 32>}, {pipeline_mode = #tpu.pipeline_mode<synchronous>, transform_indices = @transform_2, window_bounds = array<i64: 32, 1>}, {pipeline_mode = #tpu.pipeline_mode<synchronous>, transform_indices = @transform_3, window_bounds = array<i64: 1, 32>}, {transform_indices = @transform_4, window_bounds = array<i64: 1, 1, 32>}, {transform_indices = @transform_5, window_bounds = array<i64: 1, 1, 32>}, {transform_indices = @transform_6, window_bounds = array<i64: 1, 32, 32>}, {transform_indices = @transform_7, window_bounds = array<i64: 1, 32, 1>}, {transform_indices = @transform_8, window_bounds = array<i64: 1, 32, 32>}, {transform_indices = @transform_9, window_bounds = array<i64: 1, 32, 1>}, {transform_indices = @transform_10, window_bounds = array<i64: 1, 32, 32>}, {transform_indices = @transform_11, window_bounds = array<i64: 1, 32, 1>}, {transform_indices = @transform_12, window_bounds = array<i64: 1, 32, 32>}, {transform_indices = @transform_13, window_bounds = array<i64: 1, 1, 32>}, {transform_indices = @transform_14, window_bounds = array<i64: 1, 1, 32>}, {transform_indices = @transform_15, window_bounds = array<i64: 1, 1, 32>}, {transform_indices = @transform_16, window_bounds = array<i64: 1, 32, 128>}, {transform_indices = @transform_17, window_bounds = array<i64: 1, 1, 128>}, {transform_indices = @transform_18, window_bounds = array<i64: 1, 128, 32>}, {transform_indices = @transform_19, window_bounds = array<i64: 1, 1, 32>}, {pipeline_mode = #tpu.pipeline_mode<synchronous>, transform_indices = @transform_20, window_bounds = array<i64: 1, 32>}, {pipeline_mode = #tpu.pipeline_mode<synchronous>, transform_indices = @transform_21, window_bounds = array<i64: 1, 32>}, {pipeline_mode = #tpu.pipeline_mode<synchronous>, transform_indices = @transform_22, window_bounds = array<i64: 32, 32>}, {transform_indices = @transform_23, window_bounds = array<i64: 1, 4, 32>}]} {
    %c0_i32 = arith.constant 0 : i32
    %0 = arith.cmpi eq, %arg1, %c0_i32 : i32
    %1 = arith.extui %0 : i1 to i32
    %c0_i32_0 = arith.constant 0 : i32
    %2 = arith.cmpi ne, %1, %c0_i32_0 : i32
    scf.if %2 {
      %c0_80 = arith.constant 0 : index
      %c0_81 = arith.constant 0 : index
      %c0_82 = arith.constant 0 : index
      %153 = vector.load %arg3[%c0_80, %c0_81, %c0_82] : memref<1x32x32xf32, #tpu.memory_space<vmem>>, vector<1x32x32xf32>
      %154 = vector.shape_cast %153 : vector<1x32x32xf32> to vector<32x32xf32>
      %c0_83 = arith.constant 0 : index
      %c0_84 = arith.constant 0 : index
      %155 = vector.load %arg4[%c0_83, %c0_84] : memref<32x32xf32, #tpu.memory_space<vmem>>, vector<32x32xf32>
      %156 = arith.addf %154, %155 : vector<32x32xf32>
      %c0_85 = arith.constant 0 : index
      %c0_86 = arith.constant 0 : index
      %157 = vector.load %arg27[%c0_85, %c0_86] : memref<32x32xf32, #tpu.memory_space<vmem>>, vector<32x32xf32>
      tpu.vector_store %arg27[%c0_85, %c0_86], %156 {strides = array<i32>} : memref<32x32xf32, #tpu.memory_space<vmem>>, vector<32x32xf32>,
    } else {
    }
    %c0 = arith.constant 0 : index
    %c0_1 = arith.constant 0 : index
    %3 = vector.load %arg27[%c0, %c0_1] : memref<32x32xf32, #tpu.memory_space<vmem>>, vector<32x32xf32>
    %c0_2 = arith.constant 0 : index
    %c0_3 = arith.constant 0 : index
    %c0_4 = arith.constant 0 : index
    %4 = vector.load %arg7[%c0_2, %c0_3, %c0_4] : memref<1x1x32xf32, #tpu.memory_space<vmem>>, vector<1x1x32xf32>
    %5 = vector.shape_cast %4 : vector<1x1x32xf32> to vector<1x32xf32>
    %c0_5 = arith.constant 0 : index
    %c0_6 = arith.constant 0 : index
    %c0_7 = arith.constant 0 : index
    %6 = vector.load %arg8[%c0_5, %c0_6, %c0_7] : memref<1x1x32xf32, #tpu.memory_space<vmem>>, vector<1x1x32xf32>
    %7 = vector.shape_cast %6 : vector<1x1x32xf32> to vector<1x32xf32>
    %cst = arith.constant dense<0.000000e+00> : vector<32xf32>
    %8 = vector.multi_reduction <add>, %3, %cst [1] : vector<32x32xf32> to vector<32xf32>
    %9 = vector.shape_cast %8 : vector<32xf32> to vector<32x1xf32>
    %cst_8 = arith.constant 3.200000e+01 : f32
    %10 = vector.broadcast %cst_8 : f32 to vector<32x1xf32>
    %11 = arith.divf %9, %10 : vector<32x1xf32>
    %12 = vector.broadcast %11 : vector<32x1xf32> to vector<32x32xf32>
    %13 = arith.subf %3, %12 : vector<32x32xf32>
    %14 = arith.mulf %13, %13 : vector<32x32xf32>
    %cst_9 = arith.constant dense<0.000000e+00> : vector<32xf32>
    %15 = vector.multi_reduction <add>, %14, %cst_9 [1] : vector<32x32xf32> to vector<32xf32>
    %16 = vector.shape_cast %15 : vector<32xf32> to vector<32x1xf32>
    %cst_10 = arith.constant 3.200000e+01 : f32
    %17 = vector.broadcast %cst_10 : f32 to vector<32x1xf32>
    %18 = arith.divf %16, %17 : vector<32x1xf32>
    %19 = vector.broadcast %11 : vector<32x1xf32> to vector<32x32xf32>
    %20 = arith.subf %3, %19 : vector<32x32xf32>
    %cst_11 = arith.constant 9.99999974E-6 : f32
    %21 = vector.broadcast %cst_11 : f32 to vector<32x1xf32>
    %22 = arith.addf %18, %21 : vector<32x1xf32>
    %23 = math.rsqrt %22 : vector<32x1xf32>
    %24 = vector.broadcast %23 : vector<32x1xf32> to vector<32x32xf32>
    %25 = arith.mulf %20, %24 : vector<32x32xf32>
    %26 = vector.broadcast %5 : vector<1x32xf32> to vector<32x32xf32>
    %27 = arith.mulf %25, %26 : vector<32x32xf32>
    %28 = vector.broadcast %7 : vector<1x32xf32> to vector<32x32xf32>
    %29 = arith.addf %27, %28 : vector<32x32xf32>
    %30 = arith.truncf %29 : vector<32x32xf32> to vector<32x32xbf16>
    %c0_12 = arith.constant 0 : index
    %c0_13 = arith.constant 0 : index
    %c0_14 = arith.constant 0 : index
    %31 = vector.load %arg9[%c0_12, %c0_13, %c0_14] : memref<1x32x32xbf16, #tpu.memory_space<vmem>>, vector<1x32x32xbf16>
    %32 = vector.shape_cast %31 : vector<1x32x32xbf16> to vector<32x32xbf16>
    %cst_15 = arith.constant dense<0.000000e+00> : vector<32x32xf32>
    %33 = tpu.matmul %32, %30, %cst_15 {dimension_numbers = #tpu.dot_dimension_numbers<[1], [1], [0], [0], [0, 0, 1, 0], [], []>} : vector<32x32xbf16>, vector<32x32xbf16>, vector<32x32xf32> -> vector<32x32xf32>
    %c0_16 = arith.constant 0 : index
    %c0_17 = arith.constant 0 : index
    %c0_18 = arith.constant 0 : index
    %34 = vector.load %arg10[%c0_16, %c0_17, %c0_18] : memref<1x32x1xf32, #tpu.memory_space<vmem>>, vector<1x32x1xf32>
    %35 = vector.shape_cast %34 : vector<1x32x1xf32> to vector<32x1xf32>
    %36 = vector.broadcast %35 : vector<32x1xf32> to vector<32x32xf32>
    %37 = arith.addf %33, %36 : vector<32x32xf32>
    %c0_19 = arith.constant 0 : index
    %c0_20 = arith.constant 0 : index
    %c0_21 = arith.constant 0 : index
    %38 = vector.load %arg11[%c0_19, %c0_20, %c0_21] : memref<1x32x32xbf16, #tpu.memory_space<vmem>>, vector<1x32x32xbf16>
    %39 = vector.shape_cast %38 : vector<1x32x32xbf16> to vector<32x32xbf16>
    %cst_22 = arith.constant dense<0.000000e+00> : vector<32x32xf32>
    %40 = tpu.matmul %39, %30, %cst_22 {dimension_numbers = #tpu.dot_dimension_numbers<[1], [1], [0], [0], [0, 0, 1, 0], [], []>} : vector<32x32xbf16>, vector<32x32xbf16>, vector<32x32xf32> -> vector<32x32xf32>
    %c0_23 = arith.constant 0 : index
    %c0_24 = arith.constant 0 : index
    %c0_25 = arith.constant 0 : index
    %41 = vector.load %arg12[%c0_23, %c0_24, %c0_25] : memref<1x32x1xf32, #tpu.memory_space<vmem>>, vector<1x32x1xf32>
    %42 = vector.shape_cast %41 : vector<1x32x1xf32> to vector<32x1xf32>
    %43 = vector.broadcast %42 : vector<32x1xf32> to vector<32x32xf32>
    %44 = arith.addf %40, %43 : vector<32x32xf32>
    %c0_26 = arith.constant 0 : index
    %c0_27 = arith.constant 0 : index
    %c0_28 = arith.constant 0 : index
    %45 = vector.load %arg13[%c0_26, %c0_27, %c0_28] : memref<1x32x32xbf16, #tpu.memory_space<vmem>>, vector<1x32x32xbf16>
    %46 = vector.shape_cast %45 : vector<1x32x32xbf16> to vector<32x32xbf16>
    %cst_29 = arith.constant dense<0.000000e+00> : vector<32x32xf32>
    %47 = tpu.matmul %46, %30, %cst_29 {dimension_numbers = #tpu.dot_dimension_numbers<[1], [1], [0], [0], [0, 0, 1, 0], [], []>} : vector<32x32xbf16>, vector<32x32xbf16>, vector<32x32xf32> -> vector<32x32xf32>
    %c0_30 = arith.constant 0 : index
    %c0_31 = arith.constant 0 : index
    %c0_32 = arith.constant 0 : index
    %48 = vector.load %arg14[%c0_30, %c0_31, %c0_32] : memref<1x32x1xf32, #tpu.memory_space<vmem>>, vector<1x32x1xf32>
    %49 = vector.shape_cast %48 : vector<1x32x1xf32> to vector<32x1xf32>
    %50 = vector.broadcast %49 : vector<32x1xf32> to vector<32x32xf32>
    %51 = arith.addf %47, %50 : vector<32x32xf32>
    %52 = vector.shape_cast %37 : vector<32x32xf32> to vector<4x8x32xf32>
    %53 = tpu.transpose %52, [0, 2, 1] : vector<4x8x32xf32> -> vector<4x32x8xf32>
    %54 = arith.truncf %53 : vector<4x32x8xf32> to vector<4x32x8xbf16>
    %55 = vector.shape_cast %44 : vector<32x32xf32> to vector<4x8x32xf32>
    %56 = arith.truncf %55 : vector<4x8x32xf32> to vector<4x8x32xbf16>
    %57 = vector.shape_cast %51 : vector<32x32xf32> to vector<4x8x32xf32>
    %58 = arith.truncf %57 : vector<4x8x32xf32> to vector<4x8x32xbf16>
    %cst_33 = arith.constant dense<0.000000e+00> : vector<4x32x32xf32>
    %59 = tpu.matmul %54, %56, %cst_33 {dimension_numbers = #tpu.dot_dimension_numbers<[2], [1], [1], [2], [0, 0, 0, 1, 1, 2], [0], [0]>} : vector<4x32x8xbf16>, vector<4x8x32xbf16>, vector<4x32x32xf32> -> vector<4x32x32xf32>
    %60 = tpu.iota {dimensions = array<i32: 0>} : vector<32x32xi32>
    %61 = tpu.iota {dimensions = array<i32: 1>} : vector<32x32xi32>
    %c0_34 = arith.constant 0 : index
    %c0_35 = arith.constant 0 : index
    %62 = vector.load %arg5[%c0_34, %c0_35] : memref<32x1xi32, #tpu.memory_space<vmem>>, vector<32x1xi32>
    %63 = vector.shape_cast %62 : vector<32x1xi32> to vector<32x1xi32>
    %64 = vector.broadcast %63 : vector<32x1xi32> to vector<32x32xi32>
    %c0_36 = arith.constant 0 : index
    %c0_37 = arith.constant 0 : index
    %65 = vector.load %arg6[%c0_36, %c0_37] : memref<1x32xi32, #tpu.memory_space<vmem>>, vector<1x32xi32>
    %66 = vector.shape_cast %65 : vector<1x32xi32> to vector<1x32xi32>
    %67 = vector.broadcast %66 : vector<1x32xi32> to vector<32x32xi32>
    %68 = arith.cmpi eq, %64, %67 : vector<32x32xi32>
    %69 = arith.cmpi sle, %61, %60 : vector<32x32xi32>
    %70 = arith.andi %68, %69 : vector<32x32xi1>
    %cst_38 = arith.constant 0.000000e+00 : f32
    %cst_39 = arith.constant -1.000000e+09 : f32
    %71 = vector.broadcast %cst_38 : f32 to vector<32x32xf32>
    %72 = vector.broadcast %cst_39 : f32 to vector<32x32xf32>
    %73 = arith.select %70, %71, %72 : vector<32x32xi1>, vector<32x32xf32>
    %74 = vector.shape_cast %73 : vector<32x32xf32> to vector<1x32x32xf32>
    %75 = vector.broadcast %74 : vector<1x32x32xf32> to vector<4x32x32xf32>
    %76 = arith.addf %59, %75 : vector<4x32x32xf32>
    %cst_40 = arith.constant dense<0xFF800000> : vector<4x32xf32>
    %77 = vector.multi_reduction <maximumf>, %76, %cst_40 [2] : vector<4x32x32xf32> to vector<4x32xf32>
    %78 = vector.shape_cast %77 : vector<4x32xf32> to vector<4x32x1xf32>
    %79 = vector.broadcast %78 : vector<4x32x1xf32> to vector<4x32x32xf32>
    %80 = arith.subf %76, %79 : vector<4x32x32xf32>
    %81 = math.exp %80 : vector<4x32x32xf32>
    %cst_41 = arith.constant dense<0.000000e+00> : vector<4x32xf32>
    %82 = vector.multi_reduction <add>, %81, %cst_41 [2] : vector<4x32x32xf32> to vector<4x32xf32>
    %83 = vector.shape_cast %82 : vector<4x32xf32> to vector<4x32x1xf32>
    %84 = vector.broadcast %83 : vector<4x32x1xf32> to vector<4x32x32xf32>
    %85 = arith.divf %81, %84 : vector<4x32x32xf32>
    %86 = arith.truncf %85 : vector<4x32x32xf32> to vector<4x32x32xbf16>
    %cst_42 = arith.constant dense<0.000000e+00> : vector<4x8x32xf32>
    %87 = tpu.matmul %58, %86, %cst_42 {dimension_numbers = #tpu.dot_dimension_numbers<[2], [2], [1], [1], [0, 0, 0, 1, 1, 1], [0], [0]>} : vector<4x8x32xbf16>, vector<4x32x32xbf16>, vector<4x8x32xf32> -> vector<4x8x32xf32>
    %88 = vector.shape_cast %87 : vector<4x8x32xf32> to vector<32x32xf32>
    %89 = arith.truncf %88 : vector<32x32xf32> to vector<32x32xbf16>
    %c0_43 = arith.constant 0 : index
    %c0_44 = arith.constant 0 : index
    %c0_45 = arith.constant 0 : index
    %90 = vector.load %arg15[%c0_43, %c0_44, %c0_45] : memref<1x32x32xbf16, #tpu.memory_space<vmem>>, vector<1x32x32xbf16>
    %91 = vector.shape_cast %90 : vector<1x32x32xbf16> to vector<32x32xbf16>
    %cst_46 = arith.constant dense<0.000000e+00> : vector<32x32xf32>
    %92 = tpu.matmul %89, %91, %cst_46 {dimension_numbers = #tpu.dot_dimension_numbers<[0], [0], [1], [1], [0, 1, 1, 1], [], []>} : vector<32x32xbf16>, vector<32x32xbf16>, vector<32x32xf32> -> vector<32x32xf32>
    %93 = arith.addf %3, %92 : vector<32x32xf32>
    %c0_47 = arith.constant 0 : index
    %c0_48 = arith.constant 0 : index
    %c0_49 = arith.constant 0 : index
    %94 = vector.load %arg16[%c0_47, %c0_48, %c0_49] : memref<1x1x32xf32, #tpu.memory_space<vmem>>, vector<1x1x32xf32>
    %95 = vector.shape_cast %94 : vector<1x1x32xf32> to vector<1x32xf32>
    %96 = vector.broadcast %95 : vector<1x32xf32> to vector<32x32xf32>
    %97 = arith.addf %93, %96 : vector<32x32xf32>
    %c0_50 = arith.constant 0 : index
    %c0_51 = arith.constant 0 : index
    %c0_52 = arith.constant 0 : index
    %98 = vector.load %arg17[%c0_50, %c0_51, %c0_52] : memref<1x1x32xf32, #tpu.memory_space<vmem>>, vector<1x1x32xf32>
    %99 = vector.shape_cast %98 : vector<1x1x32xf32> to vector<1x32xf32>
    %c0_53 = arith.constant 0 : index
    %c0_54 = arith.constant 0 : index
    %c0_55 = arith.constant 0 : index
    %100 = vector.load %arg18[%c0_53, %c0_54, %c0_55] : memref<1x1x32xf32, #tpu.memory_space<vmem>>, vector<1x1x32xf32>
    %101 = vector.shape_cast %100 : vector<1x1x32xf32> to vector<1x32xf32>
    %cst_56 = arith.constant dense<0.000000e+00> : vector<32xf32>
    %102 = vector.multi_reduction <add>, %97, %cst_56 [1] : vector<32x32xf32> to vector<32xf32>
    %103 = vector.shape_cast %102 : vector<32xf32> to vector<32x1xf32>
    %cst_57 = arith.constant 3.200000e+01 : f32
    %104 = vector.broadcast %cst_57 : f32 to vector<32x1xf32>
    %105 = arith.divf %103, %104 : vector<32x1xf32>
    %106 = vector.broadcast %105 : vector<32x1xf32> to vector<32x32xf32>
    %107 = arith.subf %97, %106 : vector<32x32xf32>
    %108 = arith.mulf %107, %107 : vector<32x32xf32>
    %cst_58 = arith.constant dense<0.000000e+00> : vector<32xf32>
    %109 = vector.multi_reduction <add>, %108, %cst_58 [1] : vector<32x32xf32> to vector<32xf32>
    %110 = vector.shape_cast %109 : vector<32xf32> to vector<32x1xf32>
    %cst_59 = arith.constant 3.200000e+01 : f32
    %111 = vector.broadcast %cst_59 : f32 to vector<32x1xf32>
    %112 = arith.divf %110, %111 : vector<32x1xf32>
    %113 = vector.broadcast %105 : vector<32x1xf32> to vector<32x32xf32>
    %114 = arith.subf %97, %113 : vector<32x32xf32>
    %cst_60 = arith.constant 9.99999974E-6 : f32
    %115 = vector.broadcast %cst_60 : f32 to vector<32x1xf32>
    %116 = arith.addf %112, %115 : vector<32x1xf32>
    %117 = math.rsqrt %116 : vector<32x1xf32>
    %118 = vector.broadcast %117 : vector<32x1xf32> to vector<32x32xf32>
    %119 = arith.mulf %114, %118 : vector<32x32xf32>
    %120 = vector.broadcast %99 : vector<1x32xf32> to vector<32x32xf32>
    %121 = arith.mulf %119, %120 : vector<32x32xf32>
    %122 = vector.broadcast %101 : vector<1x32xf32> to vector<32x32xf32>
    %123 = arith.addf %121, %122 : vector<32x32xf32>
    %124 = arith.truncf %123 : vector<32x32xf32> to vector<32x32xbf16>
    %c0_61 = arith.constant 0 : index
    %c0_62 = arith.constant 0 : index
    %c0_63 = arith.constant 0 : index
    %125 = vector.load %arg19[%c0_61, %c0_62, %c0_63] : memref<1x32x128xbf16, #tpu.memory_space<vmem>>, vector<1x32x128xbf16>
    %126 = vector.shape_cast %125 : vector<1x32x128xbf16> to vector<32x128xbf16>
    %cst_64 = arith.constant dense<0.000000e+00> : vector<32x128xf32>
    %127 = tpu.matmul %124, %126, %cst_64 {dimension_numbers = #tpu.dot_dimension_numbers<[1], [0], [0], [1], [0, 0, 1, 1], [], []>} : vector<32x32xbf16>, vector<32x128xbf16>, vector<32x128xf32> -> vector<32x128xf32>
    %c0_65 = arith.constant 0 : index
    %c0_66 = arith.constant 0 : index
    %c0_67 = arith.constant 0 : index
    %128 = vector.load %arg20[%c0_65, %c0_66, %c0_67] : memref<1x1x128xf32, #tpu.memory_space<vmem>>, vector<1x1x128xf32>
    %129 = vector.shape_cast %128 : vector<1x1x128xf32> to vector<1x128xf32>
    %130 = vector.broadcast %129 : vector<1x128xf32> to vector<32x128xf32>
    %131 = arith.addf %127, %130 : vector<32x128xf32>
    %cst_68 = arith.constant 1.702000e+00 : f32
    %132 = vector.broadcast %cst_68 : f32 to vector<32x128xf32>
    %133 = arith.mulf %132, %131 : vector<32x128xf32>
    %134 = arith.negf %133 : vector<32x128xf32>
    %135 = math.exp %134 : vector<32x128xf32>
    %cst_69 = arith.constant 1.000000e+00 : f32
    %136 = vector.broadcast %cst_69 : f32 to vector<32x128xf32>
    %137 = arith.addf %136, %135 : vector<32x128xf32>
    %138 = arith.divf %136, %137 : vector<32x128xf32>
    %139 = arith.mulf %131, %138 : vector<32x128xf32>
    %140 = arith.truncf %139 : vector<32x128xf32> to vector<32x128xbf16>
    %c0_70 = arith.constant 0 : index
    %c0_71 = arith.constant 0 : index
    %c0_72 = arith.constant 0 : index
    %141 = vector.load %arg21[%c0_70, %c0_71, %c0_72] : memref<1x128x32xbf16, #tpu.memory_space<vmem>>, vector<1x128x32xbf16>
    %142 = vector.shape_cast %141 : vector<1x128x32xbf16> to vector<128x32xbf16>
    %cst_73 = arith.constant dense<0.000000e+00> : vector<32x32xf32>
    %143 = tpu.matmul %140, %142, %cst_73 {dimension_numbers = #tpu.dot_dimension_numbers<[1], [0], [0], [1], [0, 0, 1, 1], [], []>} : vector<32x128xbf16>, vector<128x32xbf16>, vector<32x32xf32> -> vector<32x32xf32>
    %144 = arith.addf %97, %143 : vector<32x32xf32>
    %c0_74 = arith.constant 0 : index
    %c0_75 = arith.constant 0 : index
    %c0_76 = arith.constant 0 : index
    %145 = vector.load %arg22[%c0_74, %c0_75, %c0_76] : memref<1x1x32xf32, #tpu.memory_space<vmem>>, vector<1x1x32xf32>
    %146 = vector.shape_cast %145 : vector<1x1x32xf32> to vector<1x32xf32>
    %147 = vector.broadcast %146 : vector<1x32xf32> to vector<32x32xf32>
    %148 = arith.addf %144, %147 : vector<32x32xf32>
    %c0_77 = arith.constant 0 : index
    %c0_78 = arith.constant 0 : index
    %149 = vector.load %arg27[%c0_77, %c0_78] : memref<32x32xf32, #tpu.memory_space<vmem>>, vector<32x32xf32>
    tpu.vector_store %arg27[%c0_77, %c0_78], %148 {strides = array<i32>} : memref<32x32xf32, #tpu.memory_space<vmem>>, vector<32x32xf32>,
    %c1_i32 = arith.constant 1 : i32
    %150 = arith.cmpi eq, %arg1, %c1_i32 : i32
    %151 = arith.extui %150 : i1 to i32
    %c0_i32_79 = arith.constant 0 : i32
    %152 = arith.cmpi ne, %151, %c0_i32_79 : i32
    scf.if %152 {
      %c4_i32 = arith.constant 4 : i32
      %153 = arith.muli %arg0, %c4_i32 : i32
      %c0_i32_80 = arith.constant 0 : i32
      %154 = arith.addi %153, %c0_i32_80 : i32
      %155 = arith.index_cast %154 : i32 to index
      %156 = memref.load %arg2[%155] : memref<4xi32, #tpu.memory_space<smem>>
      %c0_i32_81 = arith.constant 0 : i32
      %157 = arith.addi %c0_i32_81, %156 : i32
      %158 = arith.index_cast %157 : i32 to index
      %c0_82 = arith.constant 0 : index
      %159 = vector.load %arg27[%158, %c0_82] : memref<32x32xf32, #tpu.memory_space<vmem>>, vector<1x32xf32>
      %c4_i32_83 = arith.constant 4 : i32
      %160 = arith.muli %arg0, %c4_i32_83 : i32
      %c1_i32_84 = arith.constant 1 : i32
      %161 = arith.addi %160, %c1_i32_84 : i32
      %162 = arith.index_cast %161 : i32 to index
      %163 = memref.load %arg2[%162] : memref<4xi32, #tpu.memory_space<smem>>
      %c8_i32 = arith.constant 8 : i32
      %164 = arith.addi %c8_i32, %163 : i32
      %165 = arith.index_cast %164 : i32 to index
      %c0_85 = arith.constant 0 : index
      %166 = vector.load %arg27[%165, %c0_85] : memref<32x32xf32, #tpu.memory_space<vmem>>, vector<1x32xf32>
      %c4_i32_86 = arith.constant 4 : i32
      %167 = arith.muli %arg0, %c4_i32_86 : i32
      %c2_i32 = arith.constant 2 : i32
      %168 = arith.addi %167, %c2_i32 : i32
      %169 = arith.index_cast %168 : i32 to index
      %170 = memref.load %arg2[%169] : memref<4xi32, #tpu.memory_space<smem>>
      %c16_i32 = arith.constant 16 : i32
      %171 = arith.addi %c16_i32, %170 : i32
      %172 = arith.index_cast %171 : i32 to index
      %c0_87 = arith.constant 0 : index
      %173 = vector.load %arg27[%172, %c0_87] : memref<32x32xf32, #tpu.memory_space<vmem>>, vector<1x32xf32>
      %c4_i32_88 = arith.constant 4 : i32
      %174 = arith.muli %arg0, %c4_i32_88 : i32
      %c3_i32 = arith.constant 3 : i32
      %175 = arith.addi %174, %c3_i32 : i32
      %176 = arith.index_cast %175 : i32 to index
      %177 = memref.load %arg2[%176] : memref<4xi32, #tpu.memory_space<smem>>
      %c24_i32 = arith.constant 24 : i32
      %178 = arith.addi %c24_i32, %177 : i32
      %179 = arith.index_cast %178 : i32 to index
      %c0_89 = arith.constant 0 : index
      %180 = vector.load %arg27[%179, %c0_89] : memref<32x32xf32, #tpu.memory_space<vmem>>, vector<1x32xf32>
      %181 = tpu.concatenate %159, %166, %173, %180 in 0 : vector<1x32xf32>, vector<1x32xf32>, vector<1x32xf32>, vector<1x32xf32> -> vector<4x32xf32>
      %c0_90 = arith.constant 0 : index
      %c0_91 = arith.constant 0 : index
      %182 = vector.load %arg23[%c0_90, %c0_91] : memref<1x32xf32, #tpu.memory_space<vmem>>, vector<1x32xf32>
      %c0_92 = arith.constant 0 : index
      %c0_93 = arith.constant 0 : index
      %183 = vector.load %arg24[%c0_92, %c0_93] : memref<1x32xf32, #tpu.memory_space<vmem>>, vector<1x32xf32>
      %cst_94 = arith.constant dense<0.000000e+00> : vector<4xf32>
      %184 = vector.multi_reduction <add>, %181, %cst_94 [1] : vector<4x32xf32> to vector<4xf32>
      %185 = vector.shape_cast %184 : vector<4xf32> to vector<4x1xf32>
      %cst_95 = arith.constant 3.200000e+01 : f32
      %186 = vector.broadcast %cst_95 : f32 to vector<4x1xf32>
      %187 = arith.divf %185, %186 : vector<4x1xf32>
      %188 = vector.broadcast %187 : vector<4x1xf32> to vector<4x32xf32>
      %189 = arith.subf %181, %188 : vector<4x32xf32>
      %190 = arith.mulf %189, %189 : vector<4x32xf32>
      %cst_96 = arith.constant dense<0.000000e+00> : vector<4xf32>
      %191 = vector.multi_reduction <add>, %190, %cst_96 [1] : vector<4x32xf32> to vector<4xf32>
      %192 = vector.shape_cast %191 : vector<4xf32> to vector<4x1xf32>
      %cst_97 = arith.constant 3.200000e+01 : f32
      %193 = vector.broadcast %cst_97 : f32 to vector<4x1xf32>
      %194 = arith.divf %192, %193 : vector<4x1xf32>
      %195 = vector.broadcast %187 : vector<4x1xf32> to vector<4x32xf32>
      %196 = arith.subf %181, %195 : vector<4x32xf32>
      %cst_98 = arith.constant 9.99999974E-6 : f32
      %197 = vector.broadcast %cst_98 : f32 to vector<4x1xf32>
      %198 = arith.addf %194, %197 : vector<4x1xf32>
      %199 = math.rsqrt %198 : vector<4x1xf32>
      %200 = vector.broadcast %199 : vector<4x1xf32> to vector<4x32xf32>
      %201 = arith.mulf %196, %200 : vector<4x32xf32>
      %202 = vector.broadcast %182 : vector<1x32xf32> to vector<4x32xf32>
      %203 = arith.mulf %201, %202 : vector<4x32xf32>
      %204 = vector.broadcast %183 : vector<1x32xf32> to vector<4x32xf32>
      %205 = arith.addf %203, %204 : vector<4x32xf32>
      %206 = arith.truncf %205 : vector<4x32xf32> to vector<4x32xbf16>
      %c0_99 = arith.constant 0 : index
      %c0_100 = arith.constant 0 : index
      %207 = vector.load %arg25[%c0_99, %c0_100] : memref<32x32xbf16, #tpu.memory_space<vmem>>, vector<32x32xbf16>
      %cst_101 = arith.constant dense<0.000000e+00> : vector<4x32xf32>
      %208 = tpu.matmul %206, %207, %cst_101 {dimension_numbers = #tpu.dot_dimension_numbers<[1], [0], [0], [1], [0, 0, 1, 1], [], []>} : vector<4x32xbf16>, vector<32x32xbf16>, vector<4x32xf32> -> vector<4x32xf32>
      %c0_102 = arith.constant 0 : index
      %c0_103 = arith.constant 0 : index
      %c0_104 = arith.constant 0 : index
      %209 = vector.load %arg26[%c0_102, %c0_103, %c0_104] : memref<1x4x32xf32, #tpu.memory_space<vmem>>, vector<1x4x32xf32>
      %210 = vector.shape_cast %209 : vector<1x4x32xf32> to vector<4x32xf32>
      %211 = vector.shape_cast %208 : vector<4x32xf32> to vector<1x4x32xf32>
      tpu.vector_store %arg26[%c0_102, %c0_103, %c0_104], %211 {strides = array<i32>} : memref<1x4x32xf32, #tpu.memory_space<vmem>>, vector<1x4x32xf32>,
    } else {
    }
    return
  }
  func.func @transform_0(%arg0: i32, %arg1: i32, %arg2: memref<4xi32, #tpu.memory_space<smem>>) -> (i32, i32, i32) {
    %c0_i32 = arith.constant 0 : i32
    %c0_i32_0 = arith.constant 0 : i32
    %c0_i32_1 = arith.constant 0 : i32
    return %arg0, %c0_i32, %c0_i32_0 : i32, i32, i32
  }
  func.func @transform_1(%arg0: i32, %arg1: i32, %arg2: memref<4xi32, #tpu.memory_space<smem>>) -> (i32, i32) {
    %c0_i32 = arith.constant 0 : i32
    %c0_i32_0 = arith.constant 0 : i32
    %c0_i32_1 = arith.constant 0 : i32
    return %c0_i32, %c0_i32_0 : i32, i32
  }
  func.func @transform_2(%arg0: i32, %arg1: i32, %arg2: memref<4xi32, #tpu.memory_space<smem>>) -> (i32, i32) {
    %c0_i32 = arith.constant 0 : i32
    %c0_i32_0 = arith.constant 0 : i32
    %c0_i32_1 = arith.constant 0 : i32
    return %c0_i32, %c0_i32_0 : i32, i32
  }
  func.func @transform_3(%arg0: i32, %arg1: i32, %arg2: memref<4xi32, #tpu.memory_space<smem>>) -> (i32, i32) {
    %c0_i32 = arith.constant 0 : i32
    %c0_i32_0 = arith.constant 0 : i32
    %c0_i32_1 = arith.constant 0 : i32
    return %c0_i32, %c0_i32_0 : i32, i32
  }
  func.func @transform_4(%arg0: i32, %arg1: i32, %arg2: memref<4xi32, #tpu.memory_space<smem>>) -> (i32, i32, i32) {
    %c0_i32 = arith.constant 0 : i32
    %c0_i32_0 = arith.constant 0 : i32
    %c0_i32_1 = arith.constant 0 : i32
    return %arg1, %c0_i32, %c0_i32_0 : i32, i32, i32
  }
  func.func @transform_5(%arg0: i32, %arg1: i32, %arg2: memref<4xi32, #tpu.memory_space<smem>>) -> (i32, i32, i32) {
    %c0_i32 = arith.constant 0 : i32
    %c0_i32_0 = arith.constant 0 : i32
    %c0_i32_1 = arith.constant 0 : i32
    return %arg1, %c0_i32, %c0_i32_0 : i32, i32, i32
  }
  func.func @transform_6(%arg0: i32, %arg1: i32, %arg2: memref<4xi32, #tpu.memory_space<smem>>) -> (i32, i32, i32) {
    %c0_i32 = arith.constant 0 : i32
    %c0_i32_0 = arith.constant 0 : i32
    %c0_i32_1 = arith.constant 0 : i32
    return %arg1, %c0_i32, %c0_i32_0 : i32, i32, i32
  }
  func.func @transform_7(%arg0: i32, %arg1: i32, %arg2: memref<4xi32, #tpu.memory_space<smem>>) -> (i32, i32, i32) {
    %c0_i32 = arith.constant 0 : i32
    %c0_i32_0 = arith.constant 0 : i32
    %c0_i32_1 = arith.constant 0 : i32
    return %arg1, %c0_i32, %c0_i32_0 : i32, i32, i32
  }
  func.func @transform_8(%arg0: i32, %arg1: i32, %arg2: memref<4xi32, #tpu.memory_space<smem>>) -> (i32, i32, i32) {
    %c0_i32 = arith.constant 0 : i32
    %c0_i32_0 = arith.constant 0 : i32
    %c0_i32_1 = arith.constant 0 : i32
    return %arg1, %c0_i32, %c0_i32_0 : i32, i32, i32
  }
  func.func @transform_9(%arg0: i32, %arg1: i32, %arg2: memref<4xi32, #tpu.memory_space<smem>>) -> (i32, i32, i32) {
    %c0_i32 = arith.constant 0 : i32
    %c0_i32_0 = arith.constant 0 : i32
    %c0_i32_1 = arith.constant 0 : i32
    return %arg1, %c0_i32, %c0_i32_0 : i32, i32, i32
  }
  func.func @transform_10(%arg0: i32, %arg1: i32, %arg2: memref<4xi32, #tpu.memory_space<smem>>) -> (i32, i32, i32) {
    %c0_i32 = arith.constant 0 : i32
    %c0_i32_0 = arith.constant 0 : i32
    %c0_i32_1 = arith.constant 0 : i32
    return %arg1, %c0_i32, %c0_i32_0 : i32, i32, i32
  }
  func.func @transform_11(%arg0: i32, %arg1: i32, %arg2: memref<4xi32, #tpu.memory_space<smem>>) -> (i32, i32, i32) {
    %c0_i32 = arith.constant 0 : i32
    %c0_i32_0 = arith.constant 0 : i32
    %c0_i32_1 = arith.constant 0 : i32
    return %arg1, %c0_i32, %c0_i32_0 : i32, i32, i32
  }
  func.func @transform_12(%arg0: i32, %arg1: i32, %arg2: memref<4xi32, #tpu.memory_space<smem>>) -> (i32, i32, i32) {
    %c0_i32 = arith.constant 0 : i32
    %c0_i32_0 = arith.constant 0 : i32
    %c0_i32_1 = arith.constant 0 : i32
    return %arg1, %c0_i32, %c0_i32_0 : i32, i32, i32
  }
  func.func @transform_13(%arg0: i32, %arg1: i32, %arg2: memref<4xi32, #tpu.memory_space<smem>>) -> (i32, i32, i32) {
    %c0_i32 = arith.constant 0 : i32
    %c0_i32_0 = arith.constant 0 : i32
    %c0_i32_1 = arith.constant 0 : i32
    return %arg1, %c0_i32, %c0_i32_0 : i32, i32, i32
  }
  func.func @transform_14(%arg0: i32, %arg1: i32, %arg2: memref<4xi32, #tpu.memory_space<smem>>) -> (i32, i32, i32) {
    %c0_i32 = arith.constant 0 : i32
    %c0_i32_0 = arith.constant 0 : i32
    %c0_i32_1 = arith.constant 0 : i32
    return %arg1, %c0_i32, %c0_i32_0 : i32, i32, i32
  }
  func.func @transform_15(%arg0: i32, %arg1: i32, %arg2: memref<4xi32, #tpu.memory_space<smem>>) -> (i32, i32, i32) {
    %c0_i32 = arith.constant 0 : i32
    %c0_i32_0 = arith.constant 0 : i32
    %c0_i32_1 = arith.constant 0 : i32
    return %arg1, %c0_i32, %c0_i32_0 : i32, i32, i32
  }
  func.func @transform_16(%arg0: i32, %arg1: i32, %arg2: memref<4xi32, #tpu.memory_space<smem>>) -> (i32, i32, i32) {
    %c0_i32 = arith.constant 0 : i32
    %c0_i32_0 = arith.constant 0 : i32
    %c0_i32_1 = arith.constant 0 : i32
    return %arg1, %c0_i32, %c0_i32_0 : i32, i32, i32
  }
  func.func @transform_17(%arg0: i32, %arg1: i32, %arg2: memref<4xi32, #tpu.memory_space<smem>>) -> (i32, i32, i32) {
    %c0_i32 = arith.constant 0 : i32
    %c0_i32_0 = arith.constant 0 : i32
    %c0_i32_1 = arith.constant 0 : i32
    return %arg1, %c0_i32, %c0_i32_0 : i32, i32, i32
  }
  func.func @transform_18(%arg0: i32, %arg1: i32, %arg2: memref<4xi32, #tpu.memory_space<smem>>) -> (i32, i32, i32) {
    %c0_i32 = arith.constant 0 : i32
    %c0_i32_0 = arith.constant 0 : i32
    %c0_i32_1 = arith.constant 0 : i32
    return %arg1, %c0_i32, %c0_i32_0 : i32, i32, i32
  }
  func.func @transform_19(%arg0: i32, %arg1: i32, %arg2: memref<4xi32, #tpu.memory_space<smem>>) -> (i32, i32, i32) {
    %c0_i32 = arith.constant 0 : i32
    %c0_i32_0 = arith.constant 0 : i32
    %c0_i32_1 = arith.constant 0 : i32
    return %arg1, %c0_i32, %c0_i32_0 : i32, i32, i32
  }
  func.func @transform_20(%arg0: i32, %arg1: i32, %arg2: memref<4xi32, #tpu.memory_space<smem>>) -> (i32, i32) {
    %c0_i32 = arith.constant 0 : i32
    %c0_i32_0 = arith.constant 0 : i32
    %c0_i32_1 = arith.constant 0 : i32
    return %c0_i32, %c0_i32_0 : i32, i32
  }
  func.func @transform_21(%arg0: i32, %arg1: i32, %arg2: memref<4xi32, #tpu.memory_space<smem>>) -> (i32, i32) {
    %c0_i32 = arith.constant 0 : i32
    %c0_i32_0 = arith.constant 0 : i32
    %c0_i32_1 = arith.constant 0 : i32
    return %c0_i32, %c0_i32_0 : i32, i32
  }
  func.func @transform_22(%arg0: i32, %arg1: i32, %arg2: memref<4xi32, #tpu.memory_space<smem>>) -> (i32, i32) {
    %c0_i32 = arith.constant 0 : i32
    %c0_i32_0 = arith.constant 0 : i32
    %c0_i32_1 = arith.constant 0 : i32
    return %c0_i32, %c0_i32_0 : i32, i32
  }
  func.func @transform_23(%arg0: i32, %arg1: i32, %arg2: memref<4xi32, #tpu.memory_space<smem>>) -> (i32, i32, i32) {
    %c0_i32 = arith.constant 0 : i32
    %c0_i32_0 = arith.constant 0 : i32
    %c0_i32_1 = arith.constant 0 : i32
    return %arg0, %c0_i32, %c0_i32_0 : i32, i32, i32
  }
}

</mosaic_0001>

<bundles_post_ra>
// kernel: tpu_custom_call.1
= control target key start
LH: loop header
LB: loop body
LE: loop exit
PB: predicated region body
PF: predicated region fallthrough
CT: control target
= control target key end

     0   :  { %s4195_s0 = inlined_call_operand.vmem [shape: s32[4], index: 0, kind: input, shape index: {}]   ;;  %s4196_s1 = inlined_call_operand.vmem [shape: f32[1,32,32], index: 1, kind: input, shape index: {}]   ;;  %s4197_s2 = inlined_call_operand.vmem [shape: f32[32,32], index: 2, kind: input, shape index: {}]   ;;  %s4198_s3 = inlined_call_operand.vmem [shape: s32[32,1], index: 3, kind: input, shape index: {}]   ;;  %s4199_s4 = inlined_call_operand.vmem [shape: s32[1,32], index: 4, kind: input, shape index: {}]   ;;  %s4200_s5 = inlined_call_operand.vmem [shape: f32[2,1,32], index: 5, kind: input, shape index: {}]   ;;  %s4201_s6 = inlined_call_operand.vmem [shape: f32[2,1,32], index: 6, kind: input, shape index: {}]   ;;  %s4202_s7 = inlined_call_operand.vmem [shape: bf16[2,32,32], index: 7, kind: input, shape index: {}]   ;;  %s4203_s8 = inlined_call_operand.vmem [shape: f32[2,32,1], index: 8, kind: input, shape index: {}]   ;;  %s4204_s9 = inlined_call_operand.vmem [shape: bf16[2,32,32], index: 9, kind: input, shape index: {}]   ;;  %s4205_s10 = inlined_call_operand.vmem [shape: f32[2,32,1], index: 10, kind: input, shape index: {}]   ;;  %s4206_s11 = inlined_call_operand.vmem [shape: bf16[2,32,32], index: 11, kind: input, shape index: {}]   ;;  %s4207_s12 = inlined_call_operand.vmem [shape: f32[2,32,1], index: 12, kind: input, shape index: {}]   ;;  %s4208_s13 = inlined_call_operand.vmem [shape: bf16[2,32,32], index: 13, kind: input, shape index: {}]   ;;  %s4209_s14 = inlined_call_operand.vmem [shape: f32[2,1,32], index: 14, kind: input, shape index: {}]   ;;  %s4210_s15 = inlined_call_operand.vmem [shape: f32[2,1,32], index: 15, kind: input, shape index: {}]   ;;  %s4211_s16 = inlined_call_operand.vmem [shape: f32[2,1,32], index: 16, kind: input, shape index: {}]   ;;  %s4212_s17 = inlined_call_operand.vmem [shape: bf16[2,32,128], index: 17, kind: input, shape index: {}]   ;;  %s4213_s18 = inlined_call_operand.vmem [shape: f32[2,1,128], index: 18, kind: input, shape index: {}]   ;;  %s4214_s19 = inlined_call_operand.vmem [shape: bf16[2,128,32], index: 19, kind: input, shape index: {}]   ;;  %s4215_s20 = inlined_call_operand.vmem [shape: f32[2,1,32], index: 20, kind: input, shape index: {}]   ;;  %s4216_s21 = inlined_call_operand.vmem [shape: f32[1,32], index: 21, kind: input, shape index: {}]   ;;  %s4217_s22 = inlined_call_operand.vmem [shape: f32[1,32], index: 22, kind: input, shape index: {}]   ;;  %s4218_s23 = inlined_call_operand.vmem [shape: bf16[32,32], index: 23, kind: input, shape index: {}]   ;;  %s4219_s24 = inlined_call_operand.hbm [shape: f32[1,4,32], index: 24, kind: output, shape index: {}]  }
   0x1   :  { %4229 = sst [smem:[#allocation14_spill]] %s4195_s0 }
   0x2   :  { %4230 = sst [smem:[#allocation15_spill]] %s4196_s1  ;;  %s4248_s27 = sld [smem:[#allocation14_spill]] }
   0x3   :  { %4231 = sst [smem:[#allocation16_spill]] %s4197_s2 }
   0x4   :  { %4232 = sst [smem:[#allocation17_spill]] %s4198_s3 }
   0x5   :  { %4233 = sst [smem:[#allocation18_spill]] %s4199_s4 }
   0x6   :  { %4234 = sst [smem:[#allocation19_spill]] %s4200_s5 }
   0x7   :  { %4235 = sst [smem:[#allocation20_spill]] %s4201_s6 }
   0x8   :  { %4236 = sst [smem:[#allocation21_spill]] %s4202_s7 }
   0x9   :  { %4237 = sst [smem:[#allocation22_spill]] %s4203_s8 }
   0xa   :  { %4238 = sst [smem:[#allocation23_spill]] %s4204_s9 }
   0xb   :  { %4239 = sst [smem:[#allocation24_spill]] %s4205_s10 }
   0xc   :  { %4240 = sst [smem:[#allocation25_spill]] %s4206_s11 }
   0xd   :  { %4241 = sst [smem:[#allocation26_spill]] %s4207_s12 }
   0xe   :  { %4242 = sst [smem:[#allocation27_spill]] %s4208_s13 }
   0xf   :  { %4243 = sst [smem:[#allocation28_spill]] %s4213_s18  ;;  %s29_s18 = sshll.u32 %s4248_s27, 4  ;;  %s30_s18 = int_to_ptr.vmem [resolvable:$true] %s29_s18 }
  0x10   :  { %4244 = sst [smem:[#allocation29_spill]] %s4216_s21  ;;  %s3459_s28 = scalar_lea.vmem %s30_s18, 16 }
  0x11   :  { %4245 = sst [smem:[#allocation30_spill]] %s4217_s22  ;;  %p3460_p0 = scmp.ne.s32.totalorder %s30_s18, %s3459_s28 }
  0x12   :  { %4246 = sst [smem:[#allocation31_spill]] %s4218_s23  ;;  %p3464_p1 = scmp.lt.s32.totalorder %s30_s18, %s30_s18 }
  0x13   :  { %4247 = sst [smem:[#allocation32_spill]] %s4219_s24  ;;  %p3465_p2 = scmp.lt.s32.totalorder %s3459_s28, %s3459_s28 }
  0x15   :  { %p3466_p3 = por %p3465_p2, %p3464_p1 }
  0x17   :  { %p3467_p4 = pnand %p3466_p3, %p3460_p0 }
  0x19   :  { %3470 = shalt.err (!%p3467_p4)  }
  0x1a   :  { %s3527_s6 = smov [#allocation4]  }
  0x1b   :  { %32 = dma.vmem_to_smem %s30_s18, 16, %s3527_s6, [#allocation3] }
  0x1c   :  { %3509 = dma.done.wait [#allocation3], 16 }
  0x1d   :  { %3510 = vsyncadd [#allocation3], 4294967280 }
  0x1e   :  { %34 = sfence }
  0x1f   :  { %35 = vsyncpa [#allocation6], 0  ;;  %s3663_s2 = smov 0   ;;  %s3665_s29 = smov 0  }
  0x20   :  { %s3667_s0 = smov 0  }
  0x21 LB: > { %4249 = sst [smem:[#allocation9_spill]] %s3521_s29  ;;  %s50_s7 = sadd.s32 1, %s3521_s29  ;;  %s3525_s0 = sphi %s3667_s0, %s41_s0   ;;  %s3521_s29 = sphi %s3665_s29, %s4286_s29   ;;  %s3517_s2 = sphi %s3663_s2, %s4285_s2  }
  0x22   : > { %4250 = sst [smem:[#allocation10_spill]] %s3525_s0  ;;  %p51_p5 = scmp.ge.s32.totalorder %s50_s7, 2 }
  0x23   : > { %p2987_p6 = scmp.ge.s32.totalorder %s3525_s0, 1  ;;  %p803_p7 = scmp.lt.s32.totalorder %s3525_s0, 3 }
  0x24   : > { %s4288_s7 = smov (%p51_p5, %s50_s7), 0 }
  0x25   : > { %4251 = sst [smem:[#allocation11_spill]] %s4288_s7  ;;  %p804_p8 = pnand %p2987_p6, %p803_p7 }
  0x27   : > { %807 = sbr.rel (%p804_p8) target bundleno = 3326 (0xcfe), region = 112 }
  0x2e   : > { %p933_p9 = scmp.lt.s32.totalorder %s3517_s2, 1  ;;  %s4254_s29 = sld [smem:[#allocation21_spill]] }
  0x2f   : > { %s4255_s0 = sld [smem:[#allocation22_spill]]  ;;  %s4256_s9 = sld [smem:[#allocation23_spill]] }
  0x30   : > { %s3686_s30 = scalar_select %p933_p9, %s3517_s2, 1 }
  0x31   : > { %s4257_s10 = sld [smem:[#allocation24_spill]]  ;;  %s4258_s11 = sld [smem:[#allocation25_spill]] }
  0x32   : > { %s3075_s28 = sshll.u32 %s3686_s30, 4  ;;  %s3076_s6 = sshll.u32 %s3686_s30, 5 }
  0x33   : > { %s4260_s12 = sld [smem:[#allocation26_spill]]  ;;  %s4261_s13 = sld [smem:[#allocation27_spill]] }
  0x34   : > { %s3701_s3 = scalar_lea.vmem %s4254_s29, %s3075_s28  ;;  %s3748_s7 = scalar_lea.vmem %s4212_s17, %s3075_s28 }
  0x35   : > { %s3706_s22 = scalar_lea.vmem %s4255_s0, %s3076_s6  ;;  %s3711_s4 = scalar_lea.vmem %s4256_s9, %s3075_s28 }
  0x36   : > { %s998_s1 = scalar_lea.vmem %s4215_s20, %s3686_s30  ;;  %p3006_p10 = scmp.ne.s32.totalorder %s3517_s2, 0 }
  0x37   : > { %s3716_s26 = scalar_lea.vmem %s4257_s10, %s3076_s6  ;;  %s3721_s29 = scalar_lea.vmem %s4258_s11, %s3075_s28  ;;  %vm1016_vm0 = vcmask (!%p3006_p10), 261120  }
  0x38   : > { %4259 = sst [smem:[#allocation12_spill]] %s3721_s29  ;;  %s982_s29 = scalar_lea.vmem %s4211_s16, %s3686_s30 }
  0x39   : > { %s3726_s24 = scalar_lea.vmem %s4260_s12, %s3076_s6  ;;  %s3731_s21 = scalar_lea.vmem %s4261_s13, %s3075_s28 }
  0x3a   : > { %4262 = sst [smem:[#allocation13_spill]] %s3731_s21  ;;  %s4263_s12 = sld [smem:[#allocation28_spill]] }
  0x3b   : > { %s3083_s21 = sshll.u32 %s3686_s30, 6  ;;  %1003 = sbr.rel (%p3006_p10) target bundleno = 75 (0x4b), region = 116 }
  0x3c   : > { %s3762_s23 = scalar_lea.vmem %s4214_s19, %s3083_s21  ;;  %s4264_s27 = sld [smem:[#allocation15_spill]] (!%p3006_p10) }
  0x40   : > { %s990_s13 = scalar_lea.vmem %s4263_s12, %s3686_s30  ;;  %s4265_s12 = sld [smem:[#allocation16_spill]] (!%p3006_p10) }
  0x42   : > { %v1004_v0 = vld [vmem:[%s4264_s27] sm:$0xff]  ;;  %v1005_v2 = vld [vmem:[%s4264_s27 + $0x8] sm:$0xff]  ;;  %v1006_v5 = vld [vmem:[%s4264_s27 + $0x10] sm:$0xff] }
  0x43   : > { %v1007_v9 = vld [vmem:[%s4264_s27 + $0x18] sm:$0xff] }
  0x46   : > { %v1008_v1 = vld [vmem:[%s4265_s12] sm:$0xff]  ;;  %v1009_v4 = vld [vmem:[%s4265_s12 + $0x8] sm:$0xff]  ;;  %v1010_v6 = vld [vmem:[%s4265_s12 + $0x10] sm:$0xff] }
  0x47   : > { %v1012_v3 = vadd.f32 %v1008_v1, %v1004_v0  ;;  %v1013_v7 = vadd.f32 %v1009_v4, %v1005_v2  ;;  %v1014_v8 = vadd.f32 %v1010_v6, %v1006_v5  ;;  %v1011_v10 = vld [vmem:[%s4265_s12 + $0x18] sm:$0xff] }
  0x48   : > { %v1015_v11 = vadd.f32 %v1011_v10, %v1007_v9 }
  0x49   : > { %1017 = vst.msk [vmem:[#allocation2] sm:$0xff] %vm1016_vm0, %v1012_v3  ;;  %1018 = vst.msk [vmem:[#allocation2 + $0x8] sm:$0xff] %vm1016_vm0, %v1013_v7 }
  0x4a   : > { %1019 = vst.msk [vmem:[#allocation2 + $0x10] sm:$0xff] %vm1016_vm0, %v1014_v8  ;;  %1020 = vst.msk [vmem:[#allocation2 + $0x18] sm:$0xff] %vm1016_vm0, %v1015_v11 }
  0x4b PF: > { %vm1027_vm1 = vcmask 261120   ;;  %v3337_v40 = vld [vmem:[%s3701_s3] sm:$0xff]   ;;  %v1108_v41 = vld [vmem:[%s3706_s22 + $0x8] sm:$0xff]  ;;  %v3528_v42 = vmov 0   ;;  %v1109_v44 = vld [vmem:[%s3706_s22 + $0x10] sm:$0xff]  ;;  %s4266_s25 = sld [smem:[#allocation19_spill]] }
  0x4c   : > { %3145 = vmatprep.mubr.msk.bf16.mxu1 %vm1027_vm1, %v3337_v40  ;;  %3314 = vset.pattern.permute.xlu1 %v3528_v42  ;;  %v1107_v43 = vld [vmem:[%s3706_s22] sm:$0xff]  ;;  %v1110_v45 = vld [vmem:[%s3706_s22 + $0x18] sm:$0xff]  ;;  %v1207_v47 = vld [vmem:[%s3716_s26 + $0x8] sm:$0xff]  ;;  %s4268_s10 = sld [smem:[#allocation20_spill]]  ;;  %vm1583_vm2 = vcmask 1043456   ;;  %s4271_s28 = sld [smem:[#allocation17_spill]] }
  0x4d   : > { %3313 = vset.pattern.permute.xlu0 %v3528_v42  ;;  %v1206_v46 = vld [vmem:[%s3716_s26] sm:$0xff]  ;;  %v1208_v48 = vld [vmem:[%s3716_s26 + $0x10] sm:$0xff]  ;;  %v1209_v49 = vld [vmem:[%s3716_s26 + $0x18] sm:$0xff]  ;;  %s4270_s11 = sld [smem:[#allocation12_spill]]  ;;  %vm1576_vm3 = vcmask 64512   ;;  %s4272_s8 = sld [smem:[#allocation18_spill]] }
  0x4e   : > { %vm3531_vm0 = vmmov 0   ;;  %p3059_p11 = scmp.ne.s32.totalorder %s3517_s2, 1 }
  0x4f   : > { %s3062_s26 = sld [smem:[#allocation4 + $0x2]] (!%p3059_p11)  ;;  %s4278_s18 = sld [smem:[#allocation29_spill]] (!%p3059_p11) }
  0x50   : > { %v1021_v12 = vld [vmem:[#allocation2] sm:$0xff]  ;;  %v1022_v14 = vld [vmem:[#allocation2 + $0x8] sm:$0xff]  ;;  %s4279_s0 = sld [smem:[#allocation30_spill]] (!%p3059_p11) }
  0x51   : > { %v1023_v13 = vld [vmem:[#allocation2 + $0x10] sm:$0xff]  ;;  %v1028_v15 = vsel %vm1027_vm1, %v1021_v12, 0.0  ;;  %v1024_v17 = vld [vmem:[#allocation2 + $0x18] sm:$0xff]  ;;  %v1031_v18 = vsel %vm1027_vm1, %v1022_v14, 0.0  ;;  %s4267_s9 = scalar_lea.vmem %s4266_s25, %s3686_s30  ;;  %s3064_s25 = sld [smem:[#allocation4 + $0x3]] (!%p3059_p11) }
  0x52   : > { %v1034_v16 = vsel %vm1027_vm1, %v1023_v13, 0.0  ;;  %1029 = vadd.xlane.f32.xlu0 %v1028_v15  ;;  %v1037_v19 = vsel %vm1027_vm1, %v1024_v17, 0.0  ;;  %v3007_v0 = vld [vmem:[%s4267_s9] ss:$0 sm:$0xff]  ;;  %s4269_s5 = scalar_lea.vmem %s4268_s10, %s3686_s30 }
  0x53   : > { %1035 = vadd.xlane.f32.xlu1 %v1034_v16  ;;  %v3008_v6 = vld [vmem:[%s4269_s5] ss:$0 sm:$0xff]  ;;  %s4277_s5 = sld [smem:[#allocation31_spill]] (!%p3059_p11) }
  0x56   : > { %1032 = vadd.xlane.f32.xlu0 %v1031_v18 }
  0x57   : > { %1038 = vadd.xlane.f32.xlu1 %v1037_v19 }
  0xdf   : > { %v1030_v20 = vpop.xlane.xlu0 %1029 }
  0xe0   : > { %v1036_v21 = vpop.xlane.xlu1 %1035  ;;  %v1041_v22 = vmul.f32 0.03125, %v1030_v20  ;;  %v3338_v20 = vld [vmem:[%s3701_s3 + $0x8] sm:$0xff]   ;;  %s4275_s3 = scalar_lea.vmem %s4210_s15, %s3686_s30 }
  0xe1   : > { %v1043_v23 = vmul.f32 0.03125, %v1036_v21  ;;  %v3339_v21 = vld [vmem:[%s3711_s4] sm:$0xff]  }
  0xe2   : > { %v1045_v24 = vsub.f32 %v1021_v12, %v1041_v22  ;;  %v3340_v22 = vld [vmem:[%s3711_s4 + $0x8] sm:$0xff]  }
  0xe3   : > { %v3793_v25 = vsub.f32 %v1023_v13, %v1043_v23  ;;  %v1033_v26 = vpop.xlane.xlu0 %1032  ;;  %v3341_v23 = vld [vmem:[%s4270_s11] sm:$0xff]  }
  0xe4   : > { %v1039_v27 = vpop.xlane.xlu1 %1038  ;;  %v1042_v28 = vmul.f32 0.03125, %v1033_v26  ;;  %v1049_v30 = vmul.f32 %v1045_v24, %v1045_v24  ;;  %3161 = vmatprep.mubr.msk.bf16.mxu0 %vm1027_vm1, %v3341_v23 }
  0xe5   : > { %v1044_v29 = vmul.f32 0.03125, %v1039_v27  ;;  %v1051_v31 = vmul.f32 %v3793_v25, %v3793_v25 }
  0xe6   : > { %v1046_v32 = vsub.f32 %v1022_v14, %v1042_v28  ;;  %v1053_v34 = vsel %vm1027_vm1, %v1049_v30, 0.0 }
  0xe7   : > { %v1048_v33 = vsub.f32 %v1024_v17, %v1044_v29  ;;  %1054 = vadd.xlane.f32.xlu0 %v1053_v34  ;;  %v1059_v35 = vsel %vm1027_vm1, %v1051_v31, 0.0 }
  0xe8   : > { %v1050_v36 = vmul.f32 %v1046_v32, %v1046_v32 }
  0xe9   : > { %v1052_v37 = vmul.f32 %v1048_v33, %v1048_v33 }
  0xea   : > { %v1056_v38 = vsel %vm1027_vm1, %v1050_v36, 0.0 }
  0xeb   : > { %1060 = vadd.xlane.f32.xlu0 %v1059_v35  ;;  %1057 = vadd.xlane.f32.xlu1 %v1056_v38  ;;  %v1062_v39 = vsel %vm1027_vm1, %v1052_v37, 0.0 }
  0xef   : > { %1063 = vadd.xlane.f32.xlu1 %v1062_v39 }
 0x100   : > { %1118 = vperm.xlu1 %3314, %v1108_v41  }
 0x101   : > { %1113 = vperm.xlu0 %3313, %v1107_v43  }
 0x104   : > { %1123 = vperm.xlu1 %3314, %v1109_v44  }
 0x108   : > { %1128 = vperm.xlu1 %3314, %v1110_v45  }
 0x10c   : > { %1212 = vperm.xlu1 %3314, %v1206_v46  }
 0x110   : > { %1217 = vperm.xlu1 %3314, %v1207_v47  }
 0x114   : > { %1222 = vperm.xlu1 %3314, %v1208_v48  }
 0x118   : > { %1227 = vperm.xlu1 %3314, %v1209_v49  }
 0x174   : > { %v1055_v50 = vpop.xlane.xlu0 %1054 }
 0x175   : > { %v1065_v51 = vmul.f32 0.03125, %v1055_v50 }
 0x177   : > { %v1069_v52 = vadd.f32 1e-05, %v1065_v51 }
 0x178   : > { %v1058_v53 = vpop.xlane.xlu1 %1057  ;;  %v1061_v54 = vpop.xlane.xlu0 %1060 }
 0x179   : > { %3355 = vrsqrt.f32 %v1069_v52  ;;  %v1066_v55 = vmul.f32 0.03125, %v1058_v53  ;;  %v1067_v56 = vmul.f32 0.03125, %v1061_v54  ;;  %v1539_v53 = vld [vmem:[%s4271_s28] sm:$0xff]  ;;  %v1541_v54 = vld [vmem:[%s4271_s28 + $0x10] sm:$0xff] }
 0x17b   : > { %v1070_v57 = vadd.f32 1e-05, %v1066_v55  ;;  %v1071_v58 = vadd.f32 1e-05, %v1067_v56  ;;  %v1542_v55 = vld [vmem:[%s4271_s28 + $0x18] sm:$0xff]  ;;  %v1540_v56 = vld [vmem:[%s4271_s28 + $0x8] sm:$0xff] }
 0x17c   : > { %v1064_v59 = vpop.xlane.xlu1 %1063 }
 0x17d   : > { %3357 = vrsqrt.f32 %v1070_v57  ;;  %v1068_v60 = vmul.f32 0.03125, %v1064_v59 }
 0x17e   : > { %3359 = vrsqrt.f32 %v1071_v58 }
 0x17f   : > { %v1072_v61 = vadd.f32 1e-05, %v1068_v60 }
 0x180   : > { %v1114_v28 = vpop.permute.xlu0 %1113 }
 0x181   : > { %3361 = vrsqrt.f32 %v1072_v61 }
 0x183   : > { %v3356_v62 = vpop.eup %3355 }
 0x184   : > { %v1077_v63 = vmul.f32 %v3356_v62, %v1045_v24  ;;  %v3342_v24 = vld [vmem:[%s4270_s11 + $0x8] sm:$0xff]   ;;  %s4274_s11 = scalar_lea.vmem %s4209_s14, %s3686_s30  ;;  %s2619_s30 = sld [smem:[#allocation4]] (!%p3059_p11) }
 0x186   : > { %v1087_v4 = vmul.f32 %v3007_v0, %v1077_v63 }
 0x187   : > { %v3358_v1 = vpop.eup %3357 }
 0x188   : > { %v3360_v2 = vpop.eup %3359  ;;  %v1078_v3 = vmul.f32 %v3358_v1, %v1046_v32  ;;  %v1097_v10 = vadd.f32 %v3008_v6, %v1087_v4 }
 0x189   : > { %v1079_v5 = vmul.f32 %v3360_v2, %v3793_v25  ;;  %v1119_v25 = vpop.permute.xlu1 %1118 }
 0x18a   : > { %v1088_v7 = vmul.f32 %v3007_v0, %v1078_v3  ;;  %s2620_s9 = scalar_lea.vmem (!%p3059_p11), [#allocation2], %s2619_s30 }
 0x18b   : > { %v3362_v8 = vpop.eup %3361  ;;  %v1089_v12 = vmul.f32 %v3007_v0, %v1079_v5 }
 0x18c   : > { %v1080_v9 = vmul.f32 %v3362_v8, %v1048_v33  ;;  %v1098_v11 = vadd.f32 %v3008_v6, %v1088_v7 }
 0x18d   : > { %v1099_v16 = vadd.f32 %v3008_v6, %v1089_v12  ;;  %v1124_v26 = vpop.permute.xlu1 %1123 }
 0x18e   : > { %v1101_v13 = vpack.c.bf16 %v1098_v11, %v1097_v10  ;;  %v1090_v14 = vmul.f32 %v3007_v0, %v1080_v9 }
 0x190   : > { %3265 = vmatprep.subr.msk.bf16.mxu1 %vm1027_vm1, %v1101_v13  ;;  %3269 = vmatprep.subr.msk.bf16.mxu0 %vm1027_vm1, %v1101_v13  ;;  %v1148_v15 = vsel %vm1027_vm1, %v1101_v13, 0  ;;  %v1100_v17 = vadd.f32 %v3008_v6, %v1090_v14 }
 0x191   : > { %3142 = vmatpush3.bf16.xpose.msra.mxu1 %v1148_v15  ;;  %3158 = vmatpush3.bf16.xpose.msra.mxu0 %v1148_v15  ;;  %v1129_v27 = vpop.permute.xlu1 %1128 }
 0x192   : > { %v1102_v18 = vpack.c.bf16 %v1100_v17, %v1099_v16 }
 0x194   : > { %3266 = vmatprep.subr.msk.bf16.mxu1 %vm1027_vm1, %v1102_v18  ;;  %3270 = vmatprep.subr.msk.bf16.mxu0 %vm1027_vm1, %v1102_v18  ;;  %v1151_v19 = vsel %vm1027_vm1, %v1102_v18, 0 }
 0x195   : > { %v1213_v36 = vpop.permute.xlu1 %1212 }
 0x199   : > { %3144 = vmatpush3.bf16.xpose.msra.mxu1 %v1151_v19  ;;  %3160 = vmatpush3.bf16.xpose.msra.mxu0 %v1151_v19  ;;  %v1218_v39 = vpop.permute.xlu1 %1217 }
 0x19a   : > { %3267 = vmatprep.subr.msk.bf16.mxu1 %vm1027_vm1, %v1101_v13 }
 0x19d   : > { %v1223_v40 = vpop.permute.xlu1 %1222 }
 0x1a0   : > { %3146 = vmatmul.mubr.msk.bf16.vlgmr.msra.gmra.mrb[0].mxu1 %vm1027_vm1, %v3338_v20  ;;  %3162 = vmatmul.mubr.msk.bf16.vlgmr.msra.gmra.mrb[0].mxu0 %vm1027_vm1, %v3342_v24 }
 0x1a1   : > { %3150 = vmatpush3.bf16.xpose.msra.mxu1 %v1148_v15  ;;  %3153 = vmatprep.mubr.msk.bf16.mxu1 %vm1027_vm1, %v3339_v21  ;;  %v1228_v57 = vpop.permute.xlu1 %1227 }
 0x1a2   : > { %3268 = vmatprep.subr.msk.bf16.mxu1 %vm1027_vm1, %v1102_v18 }
 0x1a9   : > { %3152 = vmatpush3.bf16.xpose.msra.mxu1 %v1151_v19 }
 0x1b0   : > { %3154 = vmatmul.mubr.msk.bf16.vlgmr.msra.gmra.mrb[4].mxu1 %vm1027_vm1, %v3340_v22 }
 0x273   : > { %v3147_v29 = vpop.f32.mrb[0].mxu1 }
 0x274   : > { %v1187_v30 = vpop.f32.mrb[1].mxu1  ;;  %v1196_v33 = vadd.f32 %v3147_v29, %v1124_v26  ;;  %v3868_v26 = vpop.f32.mrb[0].mxu0 }
 0x275   : > { %v1188_v31 = vadd.f32 %v1187_v30, %v1114_v28  ;;  %v3148_v32 = vpop.f32.mrb[2].mxu1  ;;  %v1532_v30 = vlaneseq }
 0x276   : > { %v1199_v34 = vadd.f32 %v3148_v32, %v1129_v27  ;;  %v1190_v35 = vpop.f32.mrb[3].mxu1  ;;  %v3870_v27 = vpop.f32.mrb[1].mxu0 }
 0x277   : > { %v1191_v37 = vadd.f32 %v1190_v35, %v1119_v25  ;;  %1388 = vxpose.xlu1.b32.start.end [1/1] (short) (narrow) %v1188_v31, 32  ;;  %v3872_v28 = vpop.f32.mrb[2].mxu0  ;;  %v1533_v32 = vshrl.u32 %v1532_v30, 7  ;;  %v1538_v35 = vand.u32 127, %v1532_v30 }
 0x278   : > { %v3315_v38 = vpack.i.bf16 %v1199_v34, %v1196_v33  ;;  %v3874_v29 = vpop.f32.mrb[3].mxu0 }
 0x279   : > { %1420 = vxpose.xlu0.b32.start.end [1/1] (short) (narrow) %v1191_v37, 32  ;;  %v1535_v33 = vadd.s32 16, %v1533_v32  ;;  %v1534_v37 = vadd.s32 8, %v1533_v32  ;;  %vm1564_vm6 = vcmp.le.s32.totalorder %v1538_v35, %v1533_v32 }
 0x27b   : > { %vm1566_vm4 = vcmp.le.s32.totalorder %v1538_v35, %v1535_v33  ;;  %vm1565_vm9 = vcmp.le.s32.totalorder %v1538_v35, %v1534_v37 }
 0x283   : > { %v3155_v41 = vpop.f32.mrb[4].mxu1 }
 0x284   : > { %v1289_v42 = vadd.f32 %v3155_v41, %v1223_v40  ;;  %v1280_v43 = vpop.f32.mrb[5].mxu1 }
 0x285   : > { %v1281_v44 = vadd.f32 %v1280_v43, %v1213_v36  ;;  %v3156_v45 = vpop.f32.mrb[6].mxu1  ;;  %v3021_v36 = vld [vmem:[%s4272_s8] ss:$0 sm:$0xff]  ;;  %s2852_s8 = scalar_lea.vmem (!%p3059_p11), [#allocation2], %s3062_s26 }
 0x286   : > { %v1526_v46 = vpack.c.bf16 %v1289_v42, %v1289_v42  ;;  %v1283_v47 = vpop.f32.mrb[7].mxu1  ;;  %3316 = vxpose.xlu0.b32.start.end [1/1] (short) (narrow) %v3315_v38, 32  ;;  %v1292_v1 = vadd.f32 %v3156_v45, %v1228_v57 }
 0x287   : > { %v1524_v48 = vpack.c.bf16 %v1281_v44, %v1281_v44  ;;  %v1284_v49 = vadd.f32 %v1283_v47, %v1218_v39  ;;  %v3529_v39 = vmov -1e+09  }
 0x288   : > { %v1701_v50 = vsel %vm1583_vm2, %v1526_v46, 0  ;;  %3273 = vmatprep.subr.msk.bf16.mxu0 %vm1583_vm2, %v1526_v46  ;;  %v1527_v6 = vpack.c.bf16 %v1292_v1, %v1292_v1  ;;  %v1536_v46 = vadd.s32 24, %v1533_v32 }
 0x289   : > { %v1585_v51 = vsel %vm1583_vm2, %v1524_v48, 0  ;;  %v1525_v52 = vpack.c.bf16 %v1284_v49, %v1284_v49  ;;  %3271 = vmatprep.subr.msk.bf16.mxu1 %vm1583_vm2, %v1524_v48  ;;  %3178 = vmatpush3.bf16.msra.mxu0 %v1701_v50 }
 0x28a   : > { %3166 = vmatpush3.bf16.msra.mxu1 %v1585_v51  ;;  %v1759_v10 = vsel %vm1583_vm2, %v1527_v6, 0  ;;  %vm1567_vm13 = vcmp.le.s32.totalorder %v1538_v35, %v1536_v46 }
 0x28b   : > { %3272 = vmatprep.subr.msk.bf16.mxu1 %vm1583_vm2, %v1525_v52  ;;  %v1643_v7 = vsel %vm1583_vm2, %v1525_v52, 0 }
 0x2a1   : > { %1544 = vperm.xlu1 %3314, %v1539_v53  }
 0x2a5   : > { %1550 = vperm.xlu1 %3314, %v1541_v54  }
 0x2a9   : > { %1553 = vperm.xlu1 %3314, %v1542_v55  }
 0x2bb   : > { %1547 = vperm.xlu0 %3313, %v1540_v56  }
 0x2f7   : > { %v1404_v58 = vpop.trf.xlu1 }
 0x2f9   : > { %v1436_v59 = vpop.trf.xlu0 }
 0x2fb   : > { %v1405_v60 = vpop.trf.xlu1 }
 0x2fc   : > { %v1516_v61 = vpack.c.bf16 %v1405_v60, %v1404_v58 }
 0x2fd   : > { %v1437_v62 = vpop.trf.xlu0 }
 0x2fe   : > { %3167 = vmatprep.mubr.msk.bf16.mxu1 %vm1576_vm3, %v1516_v61  ;;  %v1518_v4 = vpack.c.bf16 %v1437_v62, %v1436_v59 }
 0x2ff   : > { %v1406_v63 = vpop.trf.xlu1 }
 0x301   : > { %v1438_v0 = vpop.trf.xlu0 }
 0x303   : > { %v1407_v2 = vpop.trf.xlu1 }
 0x304   : > { %v1517_v3 = vpack.c.bf16 %v1407_v2, %v1406_v63 }
 0x305   : > { %v1439_v5 = vpop.trf.xlu0 }
 0x306   : > { %3168 = vmatmul.mubr.msk.bf16.vlgmr.msra.gmra.mrb[8].mxu1 %vm1576_vm3, %v1517_v3  ;;  %v1519_v9 = vpack.c.bf16 %v1439_v5, %v1438_v0 }
 0x307   : > { %3172 = vmatpush3.bf16.msra.mxu1 %v1643_v7  ;;  %3173 = vmatprep.mubr.msk.bf16.mxu1 %vm1576_vm3, %v1518_v4 }
 0x308   : > { %3274 = vmatprep.subr.msk.bf16.mxu1 %vm1583_vm2, %v1527_v6  ;;  %vm2646_vm2 = vcmask (!%p3059_p11), 1040384  }
 0x309   : > { %v3317_v8 = vpop.trf.xlu0 }
 0x30a   : > { %v3321_v11 = vunpack.i.h.bf16 %v3317_v8  ;;  %v3318_v12 = vunpack.i.l.bf16 %v3317_v8 }
 0x30d   : > { %v3322_v13 = vpop.trf.xlu0 }
 0x30e   : > { %v3326_v14 = vunpack.i.h.bf16 %v3322_v13  ;;  %v3323_v15 = vunpack.i.l.bf16 %v3322_v13  ;;  %3174 = vmatmul.mubr.msk.bf16.vlgmr.msra.gmra.mrb[12].mxu1 %vm1576_vm3, %v1519_v9 }
 0x30f   : > { %3184 = vmatpush3.bf16.msra.mxu1 %v1759_v10 }
 0x310   : > { %v1520_v16 = vpack.c.bf16 %v3323_v15, %v3318_v12  ;;  %v1522_v17 = vpack.c.bf16 %v3326_v14, %v3321_v11 }
 0x311   : > { %v3327_v18 = vpop.trf.xlu0 }
 0x312   : > { %3179 = vmatprep.mubr.msk.bf16.mxu0 %vm1576_vm3, %v1520_v16  ;;  %3185 = vmatprep.mubr.msk.bf16.mxu1 %vm1576_vm3, %v1522_v17  ;;  %v3331_v19 = vunpack.i.h.bf16 %v3327_v18  ;;  %v3328_v20 = vunpack.i.l.bf16 %v3327_v18 }
 0x315   : > { %v3332_v21 = vpop.trf.xlu0 }
 0x316   : > { %v3336_v22 = vunpack.i.h.bf16 %v3332_v21  ;;  %v3333_v23 = vunpack.i.l.bf16 %v3332_v21 }
 0x318   : > { %v1521_v24 = vpack.c.bf16 %v3333_v23, %v3328_v20  ;;  %v1523_v25 = vpack.c.bf16 %v3336_v22, %v3331_v19 }
 0x31a   : > { %3180 = vmatmul.mubr.msk.bf16.vlgmr.msra.gmra.mrb[4].mxu0 %vm1576_vm3, %v1521_v24  ;;  %3186 = vmatmul.mubr.msk.bf16.vlgmr.msra.gmra.mrb[16].mxu1 %vm1576_vm3, %v1523_v25  ;;  %vm2648_vm3 = vcmask (!%p3059_p11), 1041408  }
 0x320   : > { %v1545_v31 = vpop.permute.xlu1 %1544 }
 0x321   : > { %vm1560_vm7 = vcmp.eq.s32.totalorder %v1545_v31, %v3021_v36 }
 0x322   : > { %vm1568_vm11 = vmand %vm1560_vm7, %vm1564_vm6  ;;  %vm3533_vm6 = vmmov (!%p3059_p11), 0  }
 0x323   : > { %v1572_v44 = vsel %vm1568_vm11, 0.0, %v3529_v39 }
 0x324   : > { %v1551_v34 = vpop.permute.xlu1 %1550 }
 0x325   : > { %vm1562_vm5 = vcmp.eq.s32.totalorder %v1551_v34, %v3021_v36 }
 0x326   : > { %vm1570_vm8 = vmand %vm1562_vm5, %vm1566_vm4  ;;  %vm2650_vm4 = vcmask (!%p3059_p11), 1042432   ;;  %vm2654_vm5 = vcmask (!%p3059_p11), 257024  }
 0x327   : > { %v3879_v40 = vsel %vm1570_vm8, 0.0, %v3529_v39 }
 0x328   : > { %v1554_v51 = vpop.permute.xlu1 %1553 }
 0x329   : > { %vm1563_vm14 = vcmp.eq.s32.totalorder %v1554_v51, %v3021_v36 }
 0x32a   : > { %vm1571_vm15 = vmand %vm1563_vm14, %vm1567_vm13 }
 0x32b   : > { %v1575_v63 = vsel %vm1571_vm15, 0.0, %v3529_v39 }
 0x33a   : > { %v1548_v38 = vpop.permute.xlu0 %1547 }
 0x33b   : > { %vm1561_vm10 = vcmp.eq.s32.totalorder %v1548_v38, %v3021_v36 }
 0x33c   : > { %vm1569_vm12 = vmand %vm1561_vm10, %vm1565_vm9 }
 0x33d   : > { %v1573_v47 = vsel %vm1569_vm12, 0.0, %v3529_v39 }
 0x3d9   : > { %v3169_v41 = vpop.f32.mrb[8].mxu1 }
 0x3da   : > { %v3882_v42 = vadd.f32 %v3169_v41, %v3879_v40  ;;  %v1621_v43 = vpop.f32.mrb[9].mxu1 }
 0x3db   : > { %v3170_v45 = vpop.f32.mrb[10].mxu1  ;;  %v3884_v48 = vadd.f32 %v1621_v43, %v1572_v44 }
 0x3dc   : > { %v1624_v49 = vpop.f32.mrb[11].mxu1  ;;  %v1816_v50 = vsel %vm1027_vm1, %v3882_v42, -inf  ;;  %v3903_v0 = vadd.f32 %v3170_v45, %v1575_v63 }
 0x3dd   : > { %v3888_v52 = vadd.f32 %v1624_v49, %v1573_v47  ;;  %1817 = vmax.xlane.f32.xlu1 %v1816_v50  ;;  %v1810_v54 = vsel %vm1027_vm1, %v3884_v48, -inf }
 0x3de   : > { %v1819_v4 = vsel %vm1027_vm1, %v3903_v0, -inf }
 0x3df   : > { %v1813_v53 = vsel %vm1027_vm1, %v3888_v52, -inf }
 0x3e0   : > { %1814 = vmax.xlane.f32.xlu0 %v1813_v53 }
 0x3e1   : > { %1811 = vmax.xlane.f32.xlu1 %v1810_v54  ;;  %v3175_v55 = vpop.f32.mrb[12].mxu1 }
 0x3e2   : > { %v1679_v56 = vpop.f32.mrb[13].mxu1  ;;  %v3897_v60 = vadd.f32 %v3175_v55, %v3879_v40 }
 0x3e3   : > { %v3894_v57 = vadd.f32 %v1679_v56, %v1572_v44  ;;  %v3176_v58 = vpop.f32.mrb[14].mxu1 }
 0x3e4   : > { %v1682_v59 = vpop.f32.mrb[15].mxu1  ;;  %v1828_v2 = vsel %vm1027_vm1, %v3897_v60, -inf  ;;  %v3909_v3 = vadd.f32 %v3176_v58, %v1575_v63 }
 0x3e5   : > { %v3899_v61 = vadd.f32 %v1682_v59, %v1573_v47  ;;  %v1822_v62 = vsel %vm1027_vm1, %v3894_v57, -inf }
 0x3e6   : > { %1823 = vmax.xlane.f32.xlu1 %v1822_v62  ;;  %v1831_v12 = vsel %vm1027_vm1, %v3909_v3, -inf }
 0x3e7   : > { %v1825_v1 = vsel %vm1027_vm1, %v3899_v61, -inf }
 0x3e8   : > { %1826 = vmax.xlane.f32.xlu0 %v1825_v1 }
 0x3ea   : > { %1829 = vmax.xlane.f32.xlu1 %v1828_v2 }
 0x3ec   : > { %1820 = vmax.xlane.f32.xlu0 %v1819_v4 }
 0x3ed   : > { %v3181_v5 = vpop.f32.mrb[4].mxu0  ;;  %v3187_v6 = vpop.f32.mrb[16].mxu1 }
 0x3ee   : > { %v1737_v7 = vpop.f32.mrb[5].mxu0  ;;  %v1795_v8 = vpop.f32.mrb[17].mxu1  ;;  %v1746_v15 = vadd.f32 %v3181_v5, %v3879_v40  ;;  %v3926_v24 = vadd.f32 %v3187_v6, %v3879_v40 }
 0x3ef   : > { %v1738_v9 = vadd.f32 %v1737_v7, %v1572_v44  ;;  %v3182_v10 = vpop.f32.mrb[6].mxu0  ;;  %v3188_v11 = vpop.f32.mrb[18].mxu1  ;;  %v3920_v20 = vadd.f32 %v1795_v8, %v1572_v44 }
 0x3f0   : > { %1832 = vmax.xlane.f32.xlu0 %v1831_v12  ;;  %v1740_v13 = vpop.f32.mrb[7].mxu0  ;;  %v1798_v14 = vpop.f32.mrb[19].mxu1  ;;  %v1840_v21 = vsel %vm1027_vm1, %v1746_v15, -inf  ;;  %v1749_v22 = vadd.f32 %v3182_v10, %v1575_v63  ;;  %v3930_v30 = vadd.f32 %v3188_v11, %v1575_v63  ;;  %v1852_v32 = vsel %vm1027_vm1, %v3926_v24, -inf }
 0x3f1   : > { %v1741_v16 = vadd.f32 %v1740_v13, %v1573_v47  ;;  %v1834_v17 = vsel %vm1027_vm1, %v1738_v9, -inf  ;;  %v3917_v18 = vadd.f32 %v1798_v14, %v1573_v47  ;;  %v1846_v25 = vsel %vm1027_vm1, %v3920_v20, -inf }
 0x3f2   : > { %1835 = vmax.xlane.f32.xlu1 %v1834_v17  ;;  %v1843_v31 = vsel %vm1027_vm1, %v1749_v22, -inf  ;;  %v1855_v33 = vsel %vm1027_vm1, %v3930_v30, -inf }
 0x3f3   : > { %v1837_v19 = vsel %vm1027_vm1, %v1741_v16, -inf  ;;  %v1849_v23 = vsel %vm1027_vm1, %v3917_v18, -inf }
 0x3f4   : > { %1838 = vmax.xlane.f32.xlu0 %v1837_v19 }
 0x3f6   : > { %1841 = vmax.xlane.f32.xlu1 %v1840_v21 }
 0x3f8   : > { %1850 = vmax.xlane.f32.xlu0 %v1849_v23 }
 0x3fa   : > { %1847 = vmax.xlane.f32.xlu1 %v1846_v25 }
 0x3fc   : > { %1844 = vmax.xlane.f32.xlu0 %v1843_v31 }
 0x3fe   : > { %1853 = vmax.xlane.f32.xlu1 %v1852_v32 }
 0x400   : > { %1856 = vmax.xlane.f32.xlu0 %v1855_v33 }
 0x46a   : > { %v1818_v34 = vpop.xlane.xlu1 %1817 }
 0x46b   : > { %v1860_v45 = vsub.f32 %v3882_v42, %v1818_v34 }
 0x46d   : > { %v1815_v36 = vpop.xlane.xlu0 %1814  ;;  %v1878_v51 = vmul.f32 1.442695, %v1860_v45 }
 0x46e   : > { %v1812_v35 = vpop.xlane.xlu1 %1811  ;;  %v1859_v4 = vsub.f32 %v3888_v52, %v1815_v36 }
 0x46f   : > { %v1858_v58 = vsub.f32 %v3884_v48, %v1812_v35 }
 0x471   : > { %v1874_v42 = vmul.f32 1.442695, %v1858_v58 }
 0x473   : > { %v1824_v37 = vpop.xlane.xlu1 %1823 }
 0x474   : > { %v1862_v6 = vsub.f32 %v3894_v57, %v1824_v37 }
 0x475   : > { %v1827_v38 = vpop.xlane.xlu0 %1826 }
 0x476   : > { %v1863_v57 = vsub.f32 %v3899_v61, %v1827_v38 }
 0x477   : > { %v1830_v40 = vpop.xlane.xlu1 %1829 }
 0x478   : > { %v1864_v2 = vsub.f32 %v3897_v60, %v1830_v40  ;;  %v1882_v60 = vmul.f32 1.442695, %v1862_v6  ;;  %v1884_v19 = vmul.f32 1.442695, %v1863_v57 }
 0x479   : > { %v1821_v39 = vpop.xlane.xlu0 %1820 }
 0x47a   : > { %v1861_v54 = vsub.f32 %v3903_v0, %v1821_v39  ;;  %v1886_v7 = vmul.f32 1.442695, %v1864_v2 }
 0x47c   : > { %v1880_v62 = vmul.f32 1.442695, %v1861_v54  ;;  %v1300_v54 = vld [vmem:[%s3726_s24 + $0x8] sm:$0xff] }
 0x47d   : > { %v1833_v41 = vpop.xlane.xlu0 %1832 }
 0x47e   : > { %v1865_v10 = vsub.f32 %v3909_v3, %v1833_v41 }
 0x47f   : > { %v1836_v43 = vpop.xlane.xlu1 %1835 }
 0x480   : > { %v1866_v49 = vsub.f32 %v1738_v9, %v1836_v43  ;;  %v1876_v9 = vmul.f32 1.442695, %v1859_v4  ;;  %v1888_v13 = vmul.f32 1.442695, %v1865_v10 }
 0x481   : > { %v1839_v44 = vpop.xlane.xlu0 %1838 }
 0x482   : > { %v1890_v55 = vmul.f32 1.442695, %v1866_v49  ;;  %v1867_v63 = vsub.f32 %v1741_v16, %v1839_v44 }
 0x483   : > { %v1842_v46 = vpop.xlane.xlu1 %1841 }
 0x484   : > { %v1868_v47 = vsub.f32 %v1746_v15, %v1842_v46  ;;  %v1892_v5 = vmul.f32 1.442695, %v1867_v63  ;;  %v1301_v63 = vld [vmem:[%s3726_s24 + $0x10] sm:$0xff] }
 0x485   : > { %v3938_v50 = vpop.xlane.xlu0 %1850 }
 0x486   : > { %v1894_v53 = vmul.f32 1.442695, %v1868_v47  ;;  %v1871_v31 = vsub.f32 %v3917_v18, %v3938_v50  ;;  %v1299_v47 = vld [vmem:[%s3726_s24] sm:$0xff]  ;;  %v3530_v50 = vmov 0.0  }
 0x487   : > { %v1848_v49 = vpop.xlane.xlu1 %1847  ;;  %3189 = vmatprep.subr.bf16.mxu0 %v3530_v50  ;;  %3197 = vmatprep.subr.bf16.mxu1 %v3530_v50 }
 0x488   : > { %3363 = vpow2.f32 %v1894_v53  ;;  %v1900_v36 = vmul.f32 1.442695, %v1871_v31  ;;  %3193 = vmatprep.mubr.msk.bf16.mxu0 %vm3531_vm0, %v3530_v50  ;;  %3201 = vmatprep.mubr.msk.bf16.mxu1 %vm3531_vm0, %v3530_v50 }
 0x489   : > { %v1845_v56 = vpop.xlane.xlu0 %1844  ;;  %3365 = vpow2.f32 %v1878_v51 }
 0x48a   : > { %v1869_v59 = vsub.f32 %v1749_v22, %v1845_v56  ;;  %3367 = vpow2.f32 %v1890_v55  ;;  %v1870_v55 = vsub.f32 %v3920_v20, %v1848_v49 }
 0x48b   : > { %v1854_v51 = vpop.xlane.xlu1 %1853 }
 0x48c   : > { %v1896_v1 = vmul.f32 1.442695, %v1869_v59  ;;  %v1872_v53 = vsub.f32 %v3926_v24, %v1854_v51  ;;  %v1898_v58 = vmul.f32 1.442695, %v1870_v55 }
 0x48d   : > { %v1857_v14 = vpop.xlane.xlu0 %1856 }
 0x48e   : > { %3369 = vpow2.f32 %v1896_v1  ;;  %v1873_v21 = vsub.f32 %v3930_v30, %v1857_v14  ;;  %v1902_v56 = vmul.f32 1.442695, %v1872_v53  ;;  %v1302_v1 = vld [vmem:[%s3726_s24 + $0x18] sm:$0xff]  ;;  %s4273_s24 = sld [smem:[#allocation13_spill]] }
 0x48f   : > { %3371 = vpow2.f32 %v1880_v62 }
 0x490   : > { %3373 = vpow2.f32 %v1874_v42  ;;  %v1904_v32 = vmul.f32 1.442695, %v1873_v21 }
 0x491   : > { %3375 = vpow2.f32 %v1892_v5 }
 0x492   : > { %v3944_v0 = vpop.eup %3363  ;;  %3377 = vpow2.f32 %v1886_v7 }
 0x493   : > { %v1936_v48 = vsel %vm1027_vm1, %v3944_v0, 0.0  ;;  %v3949_v8 = vpop.eup %3365  ;;  %3379 = vpow2.f32 %v1876_v9 }
 0x494   : > { %1937 = vadd.xlane.f32.xlu1 %v1936_v48  ;;  %v3952_v52 = vpop.eup %3367  ;;  %v1912_v11 = vsel %vm1027_vm1, %v3949_v8, 0.0  ;;  %3381 = vpow2.f32 %v1882_v60 }
 0x495   : > { %v1930_v16 = vsel %vm1027_vm1, %v3952_v52, 0.0  ;;  %3383 = vpow2.f32 %v1888_v13 }
 0x496   : > { %3385 = vpow2.f32 %v1884_v19 }
 0x497   : > { %3387 = vpow2.f32 %v1904_v32 }
 0x498   : > { %v3956_v12 = vpop.eup %3369  ;;  %1913 = vadd.xlane.f32.xlu1 %v1912_v11  ;;  %3389 = vpow2.f32 %v1900_v36 }
 0x499   : > { %v1939_v3 = vsel %vm1027_vm1, %v3956_v12, 0.0  ;;  %v3961_v15 = vpop.eup %3371  ;;  %3391 = vpow2.f32 %v1902_v56 }
 0x49a   : > { %1940 = vadd.xlane.f32.xlu0 %v1939_v3  ;;  %v3965_v17 = vpop.eup %3373  ;;  %v1915_v61 = vsel %vm1027_vm1, %v3961_v15, 0.0  ;;  %3393 = vpow2.f32 %v1898_v58 }
 0x49b   : > { %v3970_v22 = vpop.eup %3375  ;;  %v1906_v23 = vsel %vm1027_vm1, %v3965_v17, 0.0 }
 0x49c   : > { %1931 = vadd.xlane.f32.xlu1 %v1930_v16  ;;  %v3974_v25 = vpop.eup %3377  ;;  %v1933_v30 = vsel %vm1027_vm1, %v3970_v22, 0.0 }
 0x49d   : > { %v3980_v33 = vpop.eup %3379  ;;  %v1924_v34 = vsel %vm1027_vm1, %v3974_v25, 0.0 }
 0x49e   : > { %1916 = vadd.xlane.f32.xlu0 %v1915_v61  ;;  %v3984_v35 = vpop.eup %3381  ;;  %v1909_v37 = vsel %vm1027_vm1, %v3980_v33, 0.0 }
 0x49f   : > { %v3988_v18 = vpop.eup %3383  ;;  %v1918_v38 = vsel %vm1027_vm1, %v3984_v35, 0.0 }
 0x4a0   : > { %1907 = vadd.xlane.f32.xlu1 %v1906_v23  ;;  %v1927_v39 = vsel %vm1027_vm1, %v3988_v18, 0.0  ;;  %v3994_v40 = vpop.eup %3385 }
 0x4a1   : > { %v1921_v41 = vsel %vm1027_vm1, %v3994_v40, 0.0  ;;  %v3998_v43 = vpop.eup %3387 }
 0x4a2   : > { %1934 = vadd.xlane.f32.xlu0 %v1933_v30  ;;  %v1951_v44 = vsel %vm1027_vm1, %v3998_v43, 0.0  ;;  %v4002_v45 = vpop.eup %3389 }
 0x4a3   : > { %v1945_v46 = vsel %vm1027_vm1, %v4002_v45, 0.0  ;;  %v4016_v59 = vpop.eup %3391 }
 0x4a4   : > { %1925 = vadd.xlane.f32.xlu1 %v1924_v34  ;;  %v1948_v24 = vsel %vm1027_vm1, %v4016_v59, 0.0  ;;  %v4020_v62 = vpop.eup %3393 }
 0x4a5   : > { %v1942_v20 = vsel %vm1027_vm1, %v4020_v62, 0.0 }
 0x4a6   : > { %1910 = vadd.xlane.f32.xlu0 %v1909_v37 }
 0x4a8   : > { %1919 = vadd.xlane.f32.xlu1 %v1918_v38 }
 0x4aa   : > { %1928 = vadd.xlane.f32.xlu0 %v1927_v39 }
 0x4ae   : > { %1922 = vadd.xlane.f32.xlu0 %v1921_v41 }
 0x4b2   : > { %1952 = vadd.xlane.f32.xlu0 %v1951_v44 }
 0x4b6   : > { %1946 = vadd.xlane.f32.xlu0 %v1945_v46 }
 0x4b9   : > { %1305 = vperm.xlu1 %3314, %v1299_v47  }
 0x4cc   : > { %1310 = vperm.xlu0 %3313, %v1300_v54  }
 0x4dd   : > { %1949 = vadd.xlane.f32.xlu1 %v1948_v24 }
 0x4e1   : > { %1943 = vadd.xlane.f32.xlu1 %v1942_v20 }
 0x4f2   : > { %1315 = vperm.xlu1 %3314, %v1301_v63  }
 0x4f6   : > { %1320 = vperm.xlu1 %3314, %v1302_v1  }
 0x521   : > { %v1938_v42 = vpop.xlane.xlu1 %1937 }
 0x525   : > { %v1914_v2 = vpop.xlane.xlu1 %1913 }
 0x527   : > { %v1941_v4 = vpop.xlane.xlu0 %1940 }
 0x529   : > { %v1932_v5 = vpop.xlane.xlu1 %1931 }
 0x52b   : > { %v1917_v6 = vpop.xlane.xlu0 %1916 }
 0x52d   : > { %v1908_v7 = vpop.xlane.xlu1 %1907 }
 0x52e   : > { %3395 = vrcp.f32 %v1908_v7 }
 0x52f   : > { %v1935_v48 = vpop.xlane.xlu0 %1934 }
 0x531   : > { %v1926_v9 = vpop.xlane.xlu1 %1925 }
 0x533   : > { %v1911_v10 = vpop.xlane.xlu0 %1910 }
 0x534   : > { %3397 = vrcp.f32 %v1911_v10 }
 0x535   : > { %3399 = vrcp.f32 %v1917_v6  ;;  %v1920_v60 = vpop.xlane.xlu1 %1919 }
 0x536   : > { %3401 = vrcp.f32 %v1914_v2 }
 0x537   : > { %v1929_v11 = vpop.xlane.xlu0 %1928  ;;  %3403 = vrcp.f32 %v1920_v60 }
 0x538   : > { %v3396_v13 = vpop.eup %3395 }
 0x539   : > { %v1955_v3 = vmul.f32 %v3396_v13, %v3965_v17  ;;  %v1306_v46 = vpop.permute.xlu1 %1305 }
 0x53b   : > { %v1923_v57 = vpop.xlane.xlu0 %1922 }
 0x53c   : > { %3405 = vrcp.f32 %v1923_v57 }
 0x53d   : > { %3407 = vrcp.f32 %v1935_v48 }
 0x53e   : > { %v3398_v14 = vpop.eup %3397  ;;  %3409 = vrcp.f32 %v1929_v11 }
 0x53f   : > { %3411 = vrcp.f32 %v1932_v5  ;;  %v1957_v16 = vmul.f32 %v3398_v14, %v3980_v33  ;;  %v3400_v19 = vpop.eup %3399  ;;  %v1953_v39 = vpop.xlane.xlu0 %1952 }
 0x540   : > { %3413 = vrcp.f32 %v1926_v9  ;;  %v3402_v61 = vpop.eup %3401  ;;  %v1961_v31 = vmul.f32 %v3400_v19, %v3961_v15  ;;  %v3343_v19 = vld [vmem:[%s4273_s24] sm:$0xff]  }
 0x541   : > { %v1986_v21 = vpack.c.bf16 %v1957_v16, %v1955_v3  ;;  %v3404_v32 = vpop.eup %3403  ;;  %v1959_v30 = vmul.f32 %v3402_v61, %v3949_v8  ;;  %3415 = vrcp.f32 %v1941_v4 }
 0x542   : > { %v1963_v33 = vmul.f32 %v3404_v32, %v3984_v35  ;;  %3417 = vrcp.f32 %v1938_v42  ;;  %v1374_v35 = vadd.f32 %v3870_v27, %v1306_v46 }
 0x543   : > { %v1998_v23 = vsel %vm1027_vm1, %v1986_v21, 0  ;;  %v1987_v17 = vpack.c.bf16 %v1961_v31, %v1959_v30  ;;  %v1947_v54 = vpop.xlane.xlu0 %1946  ;;  %v3344_v21 = vld [vmem:[%s4273_s24 + $0x8] sm:$0xff]   ;;  %s2854_s24 = scalar_lea.vmem (!%p3059_p11), [#allocation2], %s3064_s25 }
 0x544   : > { %3190 = vmatpush3.bf16.xpose.msra.mxu0 %v1998_v23  ;;  %v1528_v24 = vpack.c.bf16 %v1374_v35, %v1374_v35  ;;  %3419 = vrcp.f32 %v1947_v54 }
 0x545   : > { %3191 = vmatprep.subr.bf16.mxu0 %v3530_v50  ;;  %v2001_v47 = vsel %vm1027_vm1, %v1987_v17, 0 }
 0x546   : > { %v3406_v34 = vpop.eup %3405 }
 0x547   : > { %v3408_v36 = vpop.eup %3407  ;;  %v1965_v37 = vmul.f32 %v3406_v34, %v3994_v40 }
 0x548   : > { %v3410_v38 = vpop.eup %3409  ;;  %v1973_v51 = vmul.f32 %v3408_v36, %v3970_v22 }
 0x549   : > { %v3412_v41 = vpop.eup %3411  ;;  %v1988_v44 = vpack.c.bf16 %v1965_v37, %v1963_v33  ;;  %v1969_v8 = vmul.f32 %v3410_v38, %v3988_v18 }
 0x54a   : > { %v3414_v15 = vpop.eup %3413  ;;  %v1971_v53 = vmul.f32 %v3412_v41, %v3952_v52 }
 0x54b   : > { %v2047_v49 = vsel %vm1027_vm1, %v1988_v44, 0  ;;  %v1967_v40 = vmul.f32 %v3414_v15, %v3974_v25  ;;  %v3416_v58 = vpop.eup %3415  ;;  %v1311_v20 = vpop.permute.xlu0 %1310 }
 0x54c   : > { %3192 = vmatpush3.bf16.xpose.msra.mxu0 %v2001_v47  ;;  %3198 = vmatpush3.bf16.xpose.msra.mxu1 %v2047_v49  ;;  %v1990_v56 = vpack.c.bf16 %v1973_v51, %v1971_v53  ;;  %v3418_v18 = vpop.eup %3417  ;;  %v1977_v63 = vmul.f32 %v3416_v58, %v3956_v12  ;;  %v1377_v25 = vadd.f32 %v3874_v29, %v1311_v20  ;;  %v3038_v49 = vld [vmem:[%s4274_s11] ss:$0 sm:$0xff]  ;;  %v3451_v51 = vld [vmem:[#allocation2 + $0x10] sm:$0xff]  ;;  %v3453_v58 = vld [vmem:[#allocation2 + $0x8] sm:$0xff] }
 0x54d   : > { %3199 = vmatprep.subr.bf16.mxu1 %v3530_v50  ;;  %3205 = vmatprep.subr.bf16.mxu0 %v3530_v50  ;;  %v1989_v55 = vpack.c.bf16 %v1969_v8, %v1967_v40  ;;  %v1975_v52 = vmul.f32 %v3418_v18, %v3944_v0  ;;  %v3452_v40 = vld [vmem:[#allocation2] sm:$0xff]  ;;  %v3454_v20 = vld [vmem:[#allocation2 + $0x18] sm:$0xff] }
 0x54e   : > { %v2096_v27 = vsel %vm1027_vm1, %v1990_v56, 0  ;;  %v1529_v42 = vpack.c.bf16 %v1377_v25, %v1377_v25  ;;  %v3420_v6 = vpop.eup %3419 }
 0x54f   : > { %v2050_v22 = vsel %vm1027_vm1, %v1989_v55, 0  ;;  %v1991_v1 = vpack.c.bf16 %v1977_v63, %v1975_v52  ;;  %v1981_v9 = vmul.f32 %v3420_v6, %v4002_v45 }
 0x551   : > { %v2099_v2 = vsel %vm1027_vm1, %v1991_v1, 0 }
 0x553   : > { %3194 = vmatmul.mubr.msk.bf16.vlgmr.msra.gmra.mrb[8].mxu0 %vm1027_vm1, %v1528_v24 }
 0x554   : > { %3200 = vmatpush3.bf16.xpose.msra.mxu1 %v2050_v22  ;;  %3206 = vmatpush3.bf16.xpose.msra.mxu0 %v2096_v27 }
 0x555   : > { %3207 = vmatprep.subr.bf16.mxu0 %v3530_v50  ;;  %3209 = vmatprep.mubr.msk.bf16.mxu0 %vm3531_vm0, %v3530_v50 }
 0x556   : > { %3213 = vmatprep.subr.bf16.mxu1 %v3530_v50 }
 0x55b   : > { %3202 = vmatmul.mubr.msk.bf16.vlgmr.msra.gmra.mrb[20].mxu1 %vm1027_vm1, %v1529_v42 }
 0x55c   : > { %3208 = vmatpush3.bf16.xpose.msra.mxu0 %v2099_v2  ;;  %3217 = vmatprep.mubr.msk.bf16.mxu1 %vm3531_vm0, %v3530_v50 }
 0x55d   : > { %3221 = vmatprep.subr.bf16.mxu0 %v3343_v19 }
 0x56a   : > { %v1950_v29 = vpop.xlane.xlu1 %1949 }
 0x56e   : > { %v1944_v12 = vpop.xlane.xlu1 %1943 }
 0x56f   : > { %3421 = vrcp.f32 %v1944_v12 }
 0x570   : > { %3423 = vrcp.f32 %v1950_v29 }
 0x571   : > { %3425 = vrcp.f32 %v1953_v39 }
 0x572   : > { %v1316_v0 = vpop.permute.xlu1 %1315 }
 0x573   : > { %v1382_v4 = vadd.f32 %v3868_v26, %v1316_v0 }
 0x575   : > { %v1530_v5 = vpack.c.bf16 %v1382_v4, %v1382_v4 }
 0x576   : > { %v1321_v3 = vpop.permute.xlu1 %1320 }
 0x577   : > { %3210 = vmatmul.mubr.msk.bf16.vlgmr.msra.gmra.mrb[12].mxu0 %vm1027_vm1, %v1530_v5  ;;  %v1385_v45 = vadd.f32 %v3872_v28, %v1321_v3 }
 0x578   : > { %3222 = vmatpush3.bf16.msra.mxu0 %v3343_v19  ;;  %v3346_v19 = vld [vmem:[%s3748_s7 + $0x8] sm:$0xff]  }
 0x579   : > { %v3422_v7 = vpop.eup %3421  ;;  %v1531_v16 = vpack.c.bf16 %v1385_v45, %v1385_v45  ;;  %3223 = vmatprep.subr.bf16.mxu0 %v3344_v21 }
 0x57a   : > { %v1979_v48 = vmul.f32 %v3422_v7, %v4020_v62  ;;  %v3424_v10 = vpop.eup %3423 }
 0x57b   : > { %v3426_v11 = vpop.eup %3425  ;;  %v1983_v13 = vmul.f32 %v3424_v10, %v4016_v59 }
 0x57c   : > { %v1992_v60 = vpack.c.bf16 %v1981_v9, %v1979_v48  ;;  %v1985_v26 = vmul.f32 %v3426_v11, %v3998_v43  ;;  %3224 = vmatpush3.bf16.msra.mxu0 %v3344_v21 }
 0x57e   : > { %v2145_v57 = vsel %vm1027_vm1, %v1992_v60, 0  ;;  %v1993_v14 = vpack.c.bf16 %v1985_v26, %v1983_v13 }
 0x57f   : > { %3214 = vmatpush3.bf16.xpose.msra.mxu1 %v2145_v57 }
 0x580   : > { %3215 = vmatprep.subr.bf16.mxu1 %v3530_v50  ;;  %v2148_v62 = vsel %vm1027_vm1, %v1993_v14, 0 }
 0x587   : > { %3216 = vmatpush3.bf16.xpose.msra.mxu1 %v2148_v62 }
 0x58e   : > { %3218 = vmatmul.mubr.msk.bf16.vlgmr.msra.gmra.mrb[24].mxu1 %vm1027_vm1, %v1531_v16  ;;  %v3345_v16 = vld [vmem:[%s3748_s7] sm:$0xff]  }
 0x58f   : > { %3229 = vmatprep.subr.bf16.mxu1 %v3345_v16 }
 0x590   : > { %3230 = vmatpush3.bf16.msra.mxu1 %v3345_v16 }
 0x591   : > { %3231 = vmatprep.subr.bf16.mxu1 %v3346_v19 }
 0x594   : > { %3232 = vmatpush3.bf16.msra.mxu1 %v3346_v19 }
 0x626   : > { %v2037_v59 = vpop.f32.mrb[8].mxu0 }
 0x627   : > { %v3195_v50 = vpop.f32.mrb[9].mxu0 }
 0x628   : > { %v2040_v61 = vpop.f32.mrb[10].mxu0 }
 0x629   : > { %v3196_v43 = vpop.f32.mrb[11].mxu0 }
 0x62e   : > { %v2086_v23 = vpop.f32.mrb[20].mxu1 }
 0x62f   : > { %v2190_v31 = vpack.c.bf16 %v2086_v23, %v2037_v59  ;;  %v3203_v32 = vpop.f32.mrb[21].mxu1 }
 0x630   : > { %v2089_v30 = vpop.f32.mrb[22].mxu1 }
 0x631   : > { %v3204_v34 = vpop.f32.mrb[23].mxu1  ;;  %2196 = vxpose.xlu0.c.b16.start [1/2] (short) (narrow) %v2190_v31, 32 }
 0x64a   : > { %v2135_v28 = vpop.f32.mrb[12].mxu0 }
 0x64b   : > { %v3211_v36 = vpop.f32.mrb[13].mxu0 }
 0x64c   : > { %v2138_v17 = vpop.f32.mrb[14].mxu0 }
 0x64d   : > { %v3212_v33 = vpop.f32.mrb[15].mxu0 }
 0x64e   : > { %v3039_v33 = vld [vmem:[%s4275_s3] ss:$0 sm:$0xff] }
 0x661   : > { %v2184_v37 = vpop.f32.mrb[24].mxu1 }
 0x662   : > { %v2191_v38 = vpack.c.bf16 %v2184_v37, %v2135_v28  ;;  %v3219_v39 = vpop.f32.mrb[25].mxu1 }
 0x663   : > { %v2187_v41 = vpop.f32.mrb[26].mxu1 }
 0x664   : > { %2197 = vxpose.xlu0.c.b16.end [2/2] (short) (narrow) %v2191_v38, 32  ;;  %v3220_v44 = vpop.f32.mrb[27].mxu1 }
 0x6c6   : > { %v2204_v15 = vpop.trf.xlu0 }
 0x6c7   : > { %3225 = vmatprep.mubr.msk.bf16.mxu0 %vm1027_vm1, %v2204_v15  ;;  %v3040_v15 = vld [vmem:[%s982_s29] ss:$0 sm:$0xff] }
 0x6ca   : > { %v2205_v46 = vpop.trf.xlu0 }
 0x6cb   : > { %3226 = vmatmul.mubr.msk.bf16.vlgmr.msra.gmra.mrb[16].mxu0 %vm1027_vm1, %v2205_v46 }
 0x79e   : > { %v3227_v47 = vpop.f32.mrb[16].mxu0 }
 0x79f   : > { %v2264_v8 = vpop.f32.mrb[17].mxu0  ;;  %v2281_v35 = vadd.f32 %v3451_v51, %v3227_v47 }
 0x7a0   : > { %v2279_v53 = vadd.f32 %v3452_v40, %v2264_v8  ;;  %v3228_v54 = vpop.f32.mrb[18].mxu0 }
 0x7a1   : > { %v2267_v55 = vpop.f32.mrb[19].mxu0  ;;  %v4079_v18 = vadd.f32 %v3038_v49, %v2281_v35  ;;  %v2282_v22 = vadd.f32 %v3454_v20, %v3228_v54  ;;  %v3347_v20 = vld [vmem:[%s3762_s23] sm:$0xff]  }
 0x7a2   : > { %v4077_v56 = vadd.f32 %v3038_v49, %v2279_v53  ;;  %v2280_v24 = vadd.f32 %v3453_v58, %v2267_v55  ;;  %3237 = vmatprep.subr.bf16.mxu0 %v3347_v20 }
 0x7a3   : > { %v4087_v52 = vadd.f32 %v3038_v49, %v2282_v22  ;;  %v2302_v1 = vsel %vm1027_vm1, %v4079_v18, 0.0  ;;  %3238 = vmatpush3.bf16.msra.mxu0 %v3347_v20  ;;  %v3348_v22 = vld [vmem:[%s3762_s23 + $0x8] sm:$0xff]  }
 0x7a4   : > { %v4081_v27 = vadd.f32 %v3038_v49, %v2280_v24  ;;  %v2296_v63 = vsel %vm1027_vm1, %v4077_v56, 0.0  ;;  %3239 = vmatprep.subr.bf16.mxu0 %v3348_v22 }
 0x7a5   : > { %2297 = vadd.xlane.f32.xlu1 %v2296_v63  ;;  %v2305_v42 = vsel %vm1027_vm1, %v4087_v52, 0.0  ;;  %v3349_v63 = vld [vmem:[%s3762_s23 + $0x10] sm:$0xff]  }
 0x7a6   : > { %v2299_v25 = vsel %vm1027_vm1, %v4081_v27, 0.0 }
 0x7a7   : > { %2300 = vadd.xlane.f32.xlu0 %v2299_v25  ;;  %3240 = vmatpush3.bf16.msra.mxu0 %v3348_v22  ;;  %v3350_v25 = vld [vmem:[%s3762_s23 + $0x18] sm:$0xff]  }
 0x7a8   : > { %3241 = vmatprep.subr.bf16.mxu0 %v3349_v63 }
 0x7a9   : > { %2303 = vadd.xlane.f32.xlu1 %v2302_v1  ;;  %v3351_v1 = vld [vmem:[%s3762_s23 + $0x20] sm:$0xff]  }
 0x7ab   : > { %3242 = vmatpush3.bf16.msra.mxu0 %v3349_v63 }
 0x7ac   : > { %3243 = vmatprep.subr.bf16.mxu0 %v3350_v25 }
 0x7ad   : > { %2306 = vadd.xlane.f32.xlu1 %v2305_v42  ;;  %v3352_v42 = vld [vmem:[%s3762_s23 + $0x28] sm:$0xff]  }
 0x7af   : > { %3244 = vmatpush3.bf16.msra.mxu0 %v3350_v25 }
 0x7b0   : > { %3245 = vmatprep.subr.bf16.mxu0 %v3351_v1 }
 0x7b3   : > { %3246 = vmatpush3.bf16.msra.mxu0 %v3351_v1 }
 0x7b4   : > { %3247 = vmatprep.subr.bf16.mxu0 %v3352_v42 }
 0x7b7   : > { %3248 = vmatpush3.bf16.msra.mxu0 %v3352_v42 }
 0x832   : > { %v2298_v2 = vpop.xlane.xlu1 %2297 }
 0x833   : > { %v2308_v29 = vmul.f32 0.03125, %v2298_v2  ;;  %v3353_v2 = vld [vmem:[%s3762_s23 + $0x30] sm:$0xff]  }
 0x834   : > { %v2301_v12 = vpop.xlane.xlu0 %2300  ;;  %3249 = vmatprep.subr.bf16.mxu0 %v3353_v2 }
 0x835   : > { %v2312_v0 = vsub.f32 %v4077_v56, %v2308_v29  ;;  %v2309_v4 = vmul.f32 0.03125, %v2301_v12  ;;  %3250 = vmatpush3.bf16.msra.mxu0 %v3353_v2  ;;  %v3354_v29 = vld [vmem:[%s3762_s23 + $0x38] sm:$0xff]   ;;  %v3041_v12 = vld [vmem:[%s990_s13] ss:$0 sm:$0xff] }
 0x836   : > { %v2304_v5 = vpop.xlane.xlu1 %2303  ;;  %3251 = vmatprep.subr.bf16.mxu0 %v3354_v29 }
 0x837   : > { %v2313_v6 = vsub.f32 %v4081_v27, %v2309_v4  ;;  %v2310_v7 = vmul.f32 0.03125, %v2304_v5  ;;  %v2316_v48 = vmul.f32 %v2312_v0, %v2312_v0 }
 0x839   : > { %v2314_v9 = vsub.f32 %v4079_v18, %v2310_v7  ;;  %v2320_v10 = vsel %vm1027_vm1, %v2316_v48, 0.0  ;;  %v2317_v60 = vmul.f32 %v2313_v6, %v2313_v6  ;;  %3252 = vmatpush3.bf16.msra.mxu0 %v3354_v29 }
 0x83a   : > { %2321 = vadd.xlane.f32.xlu1 %v2320_v10  ;;  %v2307_v11 = vpop.xlane.xlu1 %2306 }
 0x83b   : > { %v2311_v57 = vmul.f32 0.03125, %v2307_v11  ;;  %v2323_v13 = vsel %vm1027_vm1, %v2317_v60, 0.0  ;;  %v2318_v26 = vmul.f32 %v2314_v9, %v2314_v9 }
 0x83c   : > { %2324 = vadd.xlane.f32.xlu0 %v2323_v13 }
 0x83d   : > { %v2315_v14 = vsub.f32 %v4087_v52, %v2311_v57  ;;  %v2326_v3 = vsel %vm1027_vm1, %v2318_v26, 0.0 }
 0x83e   : > { %2327 = vadd.xlane.f32.xlu1 %v2326_v3 }
 0x83f   : > { %v2319_v62 = vmul.f32 %v2315_v14, %v2315_v14 }
 0x841   : > { %v2329_v45 = vsel %vm1027_vm1, %v2319_v62, 0.0 }
 0x842   : > { %2330 = vadd.xlane.f32.xlu0 %v2329_v45 }
 0x8c7   : > { %v2322_v21 = vpop.xlane.xlu1 %2321 }
 0x8c8   : > { %v2332_v59 = vmul.f32 0.03125, %v2322_v21 }
 0x8c9   : > { %v2325_v50 = vpop.xlane.xlu0 %2324 }
 0x8ca   : > { %v2336_v61 = vadd.f32 1e-05, %v2332_v59  ;;  %v2333_v43 = vmul.f32 0.03125, %v2325_v50 }
 0x8cb   : > { %v2328_v23 = vpop.xlane.xlu1 %2327 }
 0x8cc   : > { %3427 = vrsqrt.f32 %v2336_v61  ;;  %v2337_v31 = vadd.f32 1e-05, %v2333_v43  ;;  %v2334_v32 = vmul.f32 0.03125, %v2328_v23 }
 0x8ce   : > { %3429 = vrsqrt.f32 %v2337_v31  ;;  %v2338_v30 = vadd.f32 1e-05, %v2334_v32 }
 0x8cf   : > { %v2331_v34 = vpop.xlane.xlu0 %2330 }
 0x8d0   : > { %3431 = vrsqrt.f32 %v2338_v30  ;;  %v2335_v28 = vmul.f32 0.03125, %v2331_v34 }
 0x8d2   : > { %v2339_v36 = vadd.f32 1e-05, %v2335_v28 }
 0x8d4   : > { %3433 = vrsqrt.f32 %v2339_v36 }
 0x8d6   : > { %v3428_v17 = vpop.eup %3427 }
 0x8d7   : > { %v2344_v37 = vmul.f32 %v3428_v17, %v2312_v0 }
 0x8d8   : > { %v3430_v38 = vpop.eup %3429 }
 0x8d9   : > { %v2345_v39 = vmul.f32 %v3430_v38, %v2313_v6  ;;  %v2354_v41 = vmul.f32 %v3039_v33, %v2344_v37 }
 0x8da   : > { %v3432_v44 = vpop.eup %3431 }
 0x8db   : > { %v2346_v46 = vmul.f32 %v3432_v44, %v2314_v9  ;;  %v2355_v47 = vmul.f32 %v3039_v33, %v2345_v39  ;;  %v2364_v49 = vadd.f32 %v3040_v15, %v2354_v41  ;;  %v3058_v39 = vld [vmem:[%s998_s1] ss:$0 sm:$0xff]  ;;  %s3060_s1 = sld [smem:[#allocation4 + $0x1]] (!%p3059_p11) }
 0x8dd   : > { %v2365_v8 = vadd.f32 %v3040_v15, %v2355_v47  ;;  %v2356_v35 = vmul.f32 %v3039_v33, %v2346_v46 }
 0x8de   : > { %v3434_v51 = vpop.eup %3433 }
 0x8df   : > { %v2347_v40 = vmul.f32 %v3434_v51, %v2315_v14  ;;  %v2368_v53 = vpack.c.bf16 %v2365_v8, %v2364_v49  ;;  %v2366_v55 = vadd.f32 %v3040_v15, %v2356_v35 }
 0x8e1   : > { %v2357_v54 = vmul.f32 %v3039_v33, %v2347_v40  ;;  %3233 = vmatprep.mubr.msk.bf16.mxu1 %vm1027_vm1, %v2368_v53  ;;  %s2850_s21 = scalar_lea.vmem (!%p3059_p11), [#allocation2], %s3060_s1 }
 0x8e3   : > { %v2367_v58 = vadd.f32 %v3040_v15, %v2357_v54 }
 0x8e5   : > { %v2369_v24 = vpack.c.bf16 %v2367_v58, %v2366_v55 }
 0x8e7   : > { %3234 = vmatmul.mubr.msk.bf16.vlgmr.msra.gmra.mrb[28].mxu1 %vm1027_vm1, %v2369_v24 }
 0x9ba   : > { %v3235_v0 = vpop.f32.mrb[28].mxu1 }
 0x9bb   : > { %v2442_v4 = vadd.f32 %v3235_v0, %v3041_v12  ;;  %v2433_v5 = vpop.f32.mrb[29].mxu1  ;;  %v3532_v0 = vmov (!%p3059_p11), 0.0  }
 0x9bc   : > { %v2434_v6 = vadd.f32 %v3041_v12, %v2433_v5  ;;  %v3236_v7 = vpop.f32.mrb[30].mxu1  ;;  %3257 = vmatprep.subr.bf16.mxu0 (!%p3059_p11), %v3532_v0 }
 0x9bd   : > { %v3048_v48 = vmul.f32 -1.702, %v2442_v4  ;;  %v2445_v9 = vadd.f32 %v3236_v7, %v3041_v12  ;;  %v2436_v10 = vpop.f32.mrb[31].mxu1 }
 0x9be   : > { %v3046_v60 = vmul.f32 -1.702, %v2434_v6  ;;  %v2437_v11 = vadd.f32 %v3041_v12, %v2436_v10  ;;  %v3455_v12 = vld [vmem:[%s4277_s5] sm:$0xff] (!%p3059_p11)  }
 0x9bf   : > { %v2460_v57 = vmul.f32 1.442695, %v3048_v48  ;;  %v3049_v13 = vmul.f32 -1.702, %v2445_v9 }
 0x9c0   : > { %v2456_v26 = vmul.f32 1.442695, %v3046_v60  ;;  %v3047_v14 = vmul.f32 -1.702, %v2437_v11  ;;  %v3067_v60 = vld [vmem:[%s4279_s0] ss:$0 sm:$0xff] (!%p3059_p11) }
 0x9c1   : > { %3435 = vpow2.f32 %v2460_v57  ;;  %v2462_v3 = vmul.f32 1.442695, %v3049_v13 }
 0x9c2   : > { %3437 = vpow2.f32 %v2456_v26  ;;  %v2458_v62 = vmul.f32 1.442695, %v3047_v14 }
 0x9c3   : > { %3439 = vpow2.f32 %v2462_v3 }
 0x9c4   : > { %3441 = vpow2.f32 %v2458_v62 }
 0x9cb   : > { %v3436_v45 = vpop.eup %3435 }
 0x9cc   : > { %v3438_v16 = vpop.eup %3437  ;;  %v2466_v19 = vadd.f32 1.0, %v3436_v45 }
 0x9cd   : > { %v3440_v21 = vpop.eup %3439  ;;  %v2464_v59 = vadd.f32 1.0, %v3438_v16 }
 0x9ce   : > { %v3442_v50 = vpop.eup %3441  ;;  %3443 = vrcp.f32 %v2466_v19  ;;  %v2467_v61 = vadd.f32 1.0, %v3440_v21 }
 0x9cf   : > { %3445 = vrcp.f32 %v2464_v59  ;;  %v2465_v43 = vadd.f32 1.0, %v3442_v50 }
 0x9d0   : > { %3447 = vrcp.f32 %v2467_v61 }
 0x9d1   : > { %3449 = vrcp.f32 %v2465_v43 }
 0x9d8   : > { %v3444_v23 = vpop.eup %3443 }
 0x9d9   : > { %v3446_v31 = vpop.eup %3445  ;;  %v2478_v34 = vmul.f32 %v3444_v23, %v2442_v4  ;;  %v3456_v4 = vld [vmem:[%s4277_s5 + $0x8] sm:$0xff] (!%p3059_p11)  }
 0x9da   : > { %v3448_v32 = vpop.eup %3447  ;;  %v2476_v36 = vmul.f32 %v3446_v31, %v2434_v6 }
 0x9db   : > { %v3450_v30 = vpop.eup %3449  ;;  %v2479_v28 = vmul.f32 %v3448_v32, %v2445_v9  ;;  %v3066_v9 = vld [vmem:[%s4278_s18] ss:$0 sm:$0xff] (!%p3059_p11) }
 0x9dc   : > { %v2477_v17 = vmul.f32 %v3450_v30, %v2437_v11 }
 0x9dd   : > { %v2481_v33 = vpack.c.bf16 %v2479_v28, %v2478_v34 }
 0x9de   : > { %v2480_v37 = vpack.c.bf16 %v2477_v17, %v2476_v36 }
 0x9e0   : > { %3253 = vmatprep.mubr.bf16.mxu0 %v2480_v37 }
 0x9e1   : > { %3254 = vmatmul.mubr.bf16.vlgmr.msra.gmra.mrb[20].mxu0 %v2481_v33 }
 0x9e2   : > { %3261 = vmatprep.mubr.msk.bf16.mxu0 (!%p3059_p11), %vm3533_vm6, %v3532_v0  ;;  %3258 = vmatpush3.bf16.msra.mxu0 (!%p3059_p11), %v3455_v12 }
 0x9e3   : > { %3259 = vmatprep.subr.bf16.mxu0 (!%p3059_p11), %v3532_v0 }
 0x9e6   : > { %3260 = vmatpush3.bf16.msra.mxu0 (!%p3059_p11), %v3456_v4 }
 0xab4   : > { %v3255_v38 = vpop.f32.mrb[20].mxu0 }
 0xab5   : > { %v2597_v41 = vadd.f32 %v3255_v38, %v4079_v18  ;;  %v2580_v44 = vpop.f32.mrb[21].mxu0 }
 0xab6   : > { %v2595_v15 = vadd.f32 %v2580_v44, %v4077_v56  ;;  %v3256_v46 = vpop.f32.mrb[22].mxu0  ;;  %2617 = sbr.rel (%p3059_p11) target bundleno = 3291 (0xcdb), region = 120 }
 0xab7   : > { %v2608_v47 = vadd.f32 %v3058_v39, %v2597_v41  ;;  %v2598_v49 = vadd.f32 %v3256_v46, %v4087_v52  ;;  %v2583_v8 = vpop.f32.mrb[23].mxu0 }
 0xab8   : > { %v2606_v51 = vadd.f32 %v3058_v39, %v2595_v15  ;;  %v2596_v35 = vadd.f32 %v2583_v8, %v4081_v27 }
 0xab9   : > { %2612 = vst.msk [vmem:[#allocation2 + $0x10] sm:$0xff] %vm1027_vm1, %v2608_v47  ;;  %v2609_v40 = vadd.f32 %v3058_v39, %v2598_v49 }
 0xaba   : > { %2610 = vst.msk [vmem:[#allocation2] sm:$0xff] %vm1027_vm1, %v2606_v51  ;;  %v2607_v53 = vadd.f32 %v3058_v39, %v2596_v35 }
 0xabb   : > { %2613 = vst.msk [vmem:[#allocation2 + $0x18] sm:$0xff] %vm1027_vm1, %v2609_v40 }
 0xabc   : > { %2611 = vst.msk [vmem:[#allocation2 + $0x8] sm:$0xff] %vm1027_vm1, %v2607_v53 }
 0xac3   : > { %v2621_v56 = vld [vmem:[%s2620_s9] sm:$0x1]  ;;  %v3061_v18 = vld [vmem:[%s2850_s21 + $0x8] sm:$0x1]  ;;  %v3063_v27 = vld [vmem:[%s2852_s8 + $0x10] sm:$0x1] }
 0xac4   : > { %v3065_v52 = vld [vmem:[%s2854_s24 + $0x18] sm:$0x1]  ;;  %v2638_v54 = vrot.slane %v3061_v18, 7  ;;  %v2641_v55 = vrot.slane %v3063_v27, 6 }
 0xac5   : > { %v2644_v58 = vrot.slane %v3065_v52, 5 }
 0xac6   : > { %v2647_v24 = vsel %vm2646_vm2, %v2621_v56, %v2638_v54 }
 0xac7   : > { %v2649_v20 = vsel %vm2648_vm3, %v2647_v24, %v2641_v55 }
 0xac8   : > { %v2651_v22 = vsel %vm2650_vm4, %v2649_v20, %v2644_v58 }
 0xac9   : > { %v2655_v63 = vsel %vm2654_vm5, %v2651_v22, 0.0 }
 0xaca   : > { %2656 = vadd.xlane.f32.xlu0 %v2655_v63 }
 0xb57   : > { %v2657_v25 = vpop.xlane.xlu0 %2656 }
 0xb58   : > { %v2658_v1 = vmul.f32 0.03125, %v2657_v25 }
 0xb5a   : > { %v2659_v42 = vsub.f32 %v2651_v22, %v2658_v1 }
 0xb5c   : > { %v2660_v2 = vmul.f32 %v2659_v42, %v2659_v42 }
 0xb5e   : > { %v2661_v29 = vsel %vm2654_vm5, %v2660_v2, 0.0 }
 0xb5f   : > { %2662 = vadd.xlane.f32.xlu0 %v2661_v29 }
 0xbec   : > { %v2663_v5 = vpop.xlane.xlu0 %2662 }
 0xbed   : > { %v2664_v6 = vmul.f32 0.03125, %v2663_v5 }
 0xbef   : > { %v2665_v7 = vadd.f32 1e-05, %v2664_v6 }
 0xbf1   : > { %3457 = vrsqrt.f32 %v2665_v7 }
 0xbfb   : > { %v3458_v48 = vpop.eup %3457 }
 0xbfc   : > { %v2667_v10 = vmul.f32 %v3458_v48, %v2659_v42 }
 0xbfe   : > { %v2674_v11 = vmul.f32 %v3066_v9, %v2667_v10 }
 0xc00   : > { %v2681_v57 = vadd.f32 %v3067_v60, %v2674_v11 }
 0xc02   : > { %v2682_v13 = vpack.c.bf16 %v2681_v57, %v2681_v57 }
 0xc04   : > { %3262 = vmatmul.mubr.msk.bf16.vlgmr.msra.gmra.mrb[0].mxu0 %vm1027_vm1, %v2682_v13 }
 0xcd7   : > { %v2736_v26 = vpop.f32.mrb[0].mxu0 }
 0xcd8   : > { %2742 = vst.msk [vmem:[#allocation5] sm:$0xf] %vm2654_vm5, %v2736_v26  ;;  %v3263_v14 = vpop.f32.mrb[1].mxu0 }
 0xcd9   : > { %v2739_v3 = vpop.f32.mrb[2].mxu0 }
 0xcda   : > { %v3264_v62 = vpop.f32.mrb[3].mxu0 }
 0xcdb PF: > { %s4280_s22 = sld [smem:[#allocation10_spill]]  ;;  %s3534_s30 = smov [#allocation5]  }
 0xcdc   : > { %s2752_s1 = sshll.u32 %s3534_s30, 4  ;;  %s2753_s1 = int_to_ptr.vmem [resolvable:$true] %s2752_s1 }
 0xcdd   : > { %s3471_s26 = scalar_lea.vmem %s2753_s1, 64  ;;  %p3478_p2 = scmp.lt.s32.totalorder %s2753_s1, %s2753_s1 }
 0xcde   : > { %p3472_p13 = scmp.ne.s32.totalorder %s2753_s1, %s3471_s26  ;;  %p3479_p3 = scmp.lt.s32.totalorder %s3471_s26, %s3471_s26 }
 0xce0   : > { %p3480_p4 = por %p3479_p3, %p3478_p2 }
 0xce1   : > { %s4281_s13 = sadd.s32 4294967295, %s4280_s22  }
 0xce2   : > { %p4160_p12 = scmp.eq.s32.totalorder %s4281_s13, 1 }
 0xce4   : > { %p3473_p0 = pnand %p3472_p13, %p4160_p12 }
 0xce6   : > { %p3474_p1 = pneg %p3473_p0 }
 0xce8   : > { %p3481_p5 = pnand %p3480_p4, %p3474_p1 }
 0xcea   : > { %3484 = shalt.err (!%p3481_p5)
}
 0xceb   : > { %s4283_s21 = sld [smem:[#allocation32_spill]] }
 0xcf1   : > { %s3485_s8 = scalar_lea.hbm %s4283_s21, 64 }
 0xcf2   : > { %p3486_p6 = scmp.ne.s32.totalorder %s4283_s21, %s3485_s8  ;;  %p3491_p9 = scmp.lt.u32.totalorder %s3485_s8, %s4283_s21 }
 0xcf4   : > { %p3487_p7 = pnand %p3486_p6, %p4160_p12 }
 0xcf6   : > { %p3488_p8 = pneg %p3487_p7 }
 0xcf8   : > { %p3493_p10 = pnand %p3491_p9, %p3488_p8 }
 0xcfa   : > { %3496 = shalt.err (!%p3493_p10)
}
 0xcfb   : > { %3276 = dma.vmem_to_hbm [thread:$0]  (%p4160_p12), %s2753_s1, 64, %s4283_s21, [#allocation6]  }
 0xcfc   : > { %3512 = dma.done.wait (%p4160_p12), [#allocation6], 64  }
 0xcfd   : > { %3514 = vsyncadd (%p4160_p12), [#allocation6], 4294967232 }
 0xcfe PF: > { %s4284_s3 = sld [smem:[#allocation10_spill]]  ;;  %s4285_s2 = sld [smem:[#allocation9_spill]] }
 0xcff   : > { %s4286_s29 = sld [smem:[#allocation11_spill]] }
 0xd04   : > { %s41_s0 = sadd.s32 1, %s4284_s3  }
 0xd05   : > { %p38_p11 = scmp.ge.s32.totalorder %s41_s0, 4  }
 0xd07   :  { %40 = sbr.rel (!%p38_p11) target bundleno = 33 (0x21), region = 200 }
 0xd0e   :  { %2765 = vsyncpa [#allocation6], 1 }
 0xd0f   :  { %2767 = vsyncpa [#allocation6 + $0x1], 1 }

</bundles_post_ra>
